<compile_context>
chip_gen: v7x
topology: tpu7x:2x2x1
jax: 0.10.0
libtpu: 0.0.40
codegen_flags: <defaults>
</compile_context>

<pallas_src>
import jax
import jax.numpy as jnp
from jax.experimental import pallas as pl
from jax.experimental.pallas import tpu as pltpu

INPUT_SIZE = 1
HIDDEN_SIZE = 50
NUM_CLASSES = 2

H_PAD = 128   # hidden padded to a full lane tile -> gate slices are whole vregs
C_PAD = 128   # lane-dense logits store; sliced back to NUM_CLASSES in wrapper


def lstm_classifier_kernel(x_ref, xwb_ref, w_hh_ref, w_fc_ref, b_fc_ref, out_ref):
    """LSTM over T steps with fused gates, then the final FC.

    Ref shapes (all float32, fused gate order (i, f, o, g)):
      x_ref:    (T * B_pad, 1)    time-major input, flattened (row = t*B_pad + b)
      xwb_ref:  (2, 4*H_pad)      row 0: fused input->gate weights (I == 1)
                                  row 1: fused bias (b_ih + b_hh)
      w_hh_ref: (H_pad, 4*H_pad)  fused hidden->gate weights
      w_fc_ref: (H_pad, C_pad)    final linear weight (pre-transposed, padded)
      b_fc_ref: (1, C_pad)        final linear bias (padded)
      out_ref:  (B_pad, C_pad)    padded logits
    """
    B = out_ref.shape[0]
    T = x_ref.shape[0] // B
    H4 = w_hh_ref.shape[-1]
    H = H4 // 4

    w_hh = w_hh_ref[...]          # (H_pad, 4*H_pad), held live across the loop
    xwb = xwb_ref[...]
    w_ih_row = xwb[0:1, :]        # (1, 4*H_pad)
    bias_row = xwb[1:2, :]        # (1, 4*H_pad)

    # Input projection + bias for ALL timesteps, hoisted off the recurrent
    # critical path. Since I == 1 this is a pure-VPU broadcast multiply.
    x_proj = x_ref[...] * w_ih_row + bias_row        # (T*B_pad, 4*H_pad)

    h = jnp.zeros((B, H), jnp.float32)
    c = jnp.zeros((B, H), jnp.float32)

    # T is a compile-time constant -> fully unrolled recurrence; each step is a
    # single fused (B, H_pad) x (H_pad, 4*H_pad) MXU matmul plus VPU/EUP work.
    for t in range(T):
        z = x_proj[t * B:(t + 1) * B, :] + jnp.dot(
            h, w_hh, preferred_element_type=jnp.float32)       # (B, 4*H_pad)
        sig = jax.nn.sigmoid(z[:, :3 * H])                      # i, f, o gates
        g_g = jnp.tanh(z[:, 3 * H:])                            # g gate
        i_g = sig[:, :H]
        f_g = sig[:, H:2 * H]
        o_g = sig[:, 2 * H:3 * H]
        c = f_g * c + i_g * g_g
        h = o_g * jnp.tanh(c)

    out_ref[...] = (jnp.dot(h, w_fc_ref[...], preferred_element_type=jnp.float32)
                    + b_fc_ref[...])


def pack_params(params, h_pad=H_PAD, c_pad=C_PAD):
    """PyTorch-ordered (i,f,g,o) params -> fused, zero-padded kernel params."""
    w_ih, w_hh, b, w_fc, b_fc = params
    H = w_hh.shape[-1]
    C = w_fc.shape[-1]
    order = (0, 1, 3, 2)  # (i, f, g, o) -> (i, f, o, g): sigmoid lanes contiguous

    def pad_h(v):  # pad trailing hidden axis H -> h_pad
        return jnp.pad(v, [(0, 0)] * (v.ndim - 1) + [(0, h_pad - H)])

    w_ih_row = jnp.concatenate([pad_h(w_ih[k][0]) for k in order])     # (4*h_pad,)
    bias_row = jnp.concatenate([pad_h(b[k][0]) for k in order])        # (4*h_pad,)
    xwb = jnp.stack([w_ih_row, bias_row], axis=0)                      # (2, 4*h_pad)

    w_hh_fused = jnp.concatenate(
        [jnp.pad(w_hh[k], ((0, h_pad - H), (0, h_pad - H))) for k in order],
        axis=1)                                                        # (h_pad, 4*h_pad)

    w_fc_p = jnp.pad(w_fc, ((0, h_pad - H), (0, c_pad - C)))           # (h_pad, c_pad)
    b_fc_p = jnp.pad(b_fc, ((0, 0), (0, c_pad - C)))                   # (1, c_pad)
    return xwb, w_hh_fused, w_fc_p, b_fc_p


def time_series_classifier(x, params):
    """x: (B, T, I) batch-first float32 (PyTorch convention). Returns (B, C)."""
    B, T, I = x.shape
    assert I == INPUT_SIZE == 1
    C = params[3].shape[-1]
    b_pad = pl.cdiv(B, 8) * 8   # pad batch to a full f32 sublane tile

    # Time-major, batch-padded, flattened to 2D (row = t*B_pad + b).
    x_tb = jnp.transpose(x, (1, 0, 2))                        # (T, B, 1)
    x_tb = jnp.pad(x_tb, ((0, 0), (0, b_pad - B), (0, 0)))    # (T, B_pad, 1)
    x_flat = x_tb.reshape(T * b_pad, 1)

    xwb, w_hh_f, w_fc_p, b_fc_p = pack_params(params)

    out_pad = pl.pallas_call(
        lstm_classifier_kernel,
        out_shape=jax.ShapeDtypeStruct((b_pad, C_PAD), jnp.float32),
        in_specs=[pl.BlockSpec(memory_space=pltpu.MemorySpace.VMEM)] * 5,
        out_specs=pl.BlockSpec(memory_space=pltpu.MemorySpace.VMEM),
    )(x_flat, xwb, w_hh_f, w_fc_p, b_fc_p)
    return out_pad[:B, :C]


def init_params(key, input_size=INPUT_SIZE, hidden_size=HIDDEN_SIZE,
                num_classes=NUM_CLASSES):
    """Deterministic init matching torch.nn.LSTM / Linear shapes (U(-k, k))."""
    k_lstm = 1.0 / jnp.sqrt(jnp.float32(hidden_size))
    k_fc = 1.0 / jnp.sqrt(jnp.float32(hidden_size))
    ks = jax.random.split(key, 6)
    # Stored pre-transposed for right-multiplication, PyTorch gate order (i,f,g,o).
    w_ih = jax.random.uniform(ks[0], (4, input_size, hidden_size),
                              jnp.float32, -k_lstm, k_lstm)
    w_hh = jax.random.uniform(ks[1], (4, hidden_size, hidden_size),
                              jnp.float32, -k_lstm, k_lstm)
    b_ih = jax.random.uniform(ks[2], (4, 1, hidden_size),
                              jnp.float32, -k_lstm, k_lstm)
    b_hh = jax.random.uniform(ks[3], (4, 1, hidden_size),
                              jnp.float32, -k_lstm, k_lstm)
    w_fc = jax.random.uniform(ks[4], (hidden_size, num_classes),
                              jnp.float32, -k_fc, k_fc)
    b_fc = jax.random.uniform(ks[5], (1, num_classes),
                              jnp.float32, -k_fc, k_fc)
    return w_ih, w_hh, b_ih + b_hh, w_fc, b_fc


def reference_forward(x, params):
    """Pure-JAX reference identical in math to torch's LSTM + Linear."""
    w_ih, w_hh, b, w_fc, b_fc = params
    B, T, _ = x.shape
    H = w_hh.shape[-1]

    def step(carry, x_t):
        h, c = carry
        gates = [jnp.dot(x_t, w_ih[k]) + jnp.dot(h, w_hh[k]) + b[k]
                 for k in range(4)]
        i_g = jax.nn.sigmoid(gates[0])
        f_g = jax.nn.sigmoid(gates[1])
        g_g = jnp.tanh(gates[2])
        o_g = jax.nn.sigmoid(gates[3])
        c_new = f_g * c + i_g * g_g
        h_new = o_g * jnp.tanh(c_new)
        return (h_new, c_new), None

    (h_last, _), _ = jax.lax.scan(
        step, (jnp.zeros((B, H)), jnp.zeros((B, H))),
        jnp.transpose(x, (1, 0, 2)))
    return jnp.dot(h_last, w_fc) + b_fc


if __name__ == "__main__":
    key = jax.random.PRNGKey(0)
    k_x, k_p = jax.random.split(key)

    batch, seq_len = 2, 8
    x = jax.random.normal(k_x, (batch, seq_len, INPUT_SIZE), jnp.float32)
    params = init_params(k_p)

    out = time_series_classifier(x, params)
    out = jax.block_until_ready(out)

    ref = jax.block_until_ready(reference_forward(x, params))
    assert out.shape == (batch, NUM_CLASSES)
    assert jnp.allclose(out, ref, atol=1e-4, rtol=1e-4), (out, ref)

    print("KERNEL_OK")
</pallas_src>

<mosaic_0001>
module attributes {stable_mosaic.version = 11 : i64} {
  func.func @lstm_classifier_kernel(%arg0: memref<64x1xf32, #tpu.memory_space<vmem>>, %arg1: memref<2x512xf32, #tpu.memory_space<vmem>>, %arg2: memref<128x512xf32, #tpu.memory_space<vmem>>, %arg3: memref<128x128xf32, #tpu.memory_space<vmem>>, %arg4: memref<1x128xf32, #tpu.memory_space<vmem>>, %arg5: memref<8x128xf32, #tpu.memory_space<vmem>>) attributes {dimension_semantics = [], scalar_prefetch = 0 : i64, scratch_operands = 0 : i64, tpu.core_type = #tpu.core_type<tc>} {
    %c0 = arith.constant 0 : index
    %c0_0 = arith.constant 0 : index
    %0 = vector.load %arg2[%c0, %c0_0] : memref<128x512xf32, #tpu.memory_space<vmem>>, vector<128x512xf32>
    %c0_1 = arith.constant 0 : index
    %c0_2 = arith.constant 0 : index
    %1 = vector.load %arg1[%c0_1, %c0_2] : memref<2x512xf32, #tpu.memory_space<vmem>>, vector<2x512xf32>
    %2 = vector.extract_strided_slice %1 {offsets = [0, 0], sizes = [1, 512], strides = [1, 1]} : vector<2x512xf32> to vector<1x512xf32>
    %3 = vector.extract_strided_slice %1 {offsets = [1, 0], sizes = [1, 512], strides = [1, 1]} : vector<2x512xf32> to vector<1x512xf32>
    %c0_3 = arith.constant 0 : index
    %c0_4 = arith.constant 0 : index
    %4 = vector.load %arg0[%c0_3, %c0_4] : memref<64x1xf32, #tpu.memory_space<vmem>>, vector<64x1xf32>
    %5 = vector.broadcast %4 : vector<64x1xf32> to vector<64x512xf32>
    %6 = vector.broadcast %2 : vector<1x512xf32> to vector<64x512xf32>
    %7 = arith.mulf %5, %6 : vector<64x512xf32>
    %8 = vector.broadcast %3 : vector<1x512xf32> to vector<64x512xf32>
    %9 = arith.addf %7, %8 : vector<64x512xf32>
    %cst = arith.constant 0.000000e+00 : f32
    %10 = vector.broadcast %cst : f32 to vector<8x128xf32>
    %cst_5 = arith.constant 0.000000e+00 : f32
    %11 = vector.broadcast %cst_5 : f32 to vector<8x128xf32>
    %12 = vector.extract_strided_slice %9 {offsets = [0, 0], sizes = [8, 512], strides = [1, 1]} : vector<64x512xf32> to vector<8x512xf32>
    %cst_6 = arith.constant dense<0.000000e+00> : vector<8x512xf32>
    %13 = tpu.matmul %10, %0, %cst_6 {dimension_numbers = #tpu.dot_dimension_numbers<[1], [0], [0], [1], [0, 0, 1, 1], [], []>} : vector<8x128xf32>, vector<128x512xf32>, vector<8x512xf32> -> vector<8x512xf32>
    %14 = arith.addf %12, %13 : vector<8x512xf32>
    %15 = vector.extract_strided_slice %14 {offsets = [0, 0], sizes = [8, 384], strides = [1, 1]} : vector<8x512xf32> to vector<8x384xf32>
    %16 = arith.negf %15 : vector<8x384xf32>
    %17 = math.exp %16 : vector<8x384xf32>
    %cst_7 = arith.constant 1.000000e+00 : f32
    %18 = vector.broadcast %cst_7 : f32 to vector<8x384xf32>
    %19 = arith.addf %18, %17 : vector<8x384xf32>
    %20 = arith.divf %18, %19 : vector<8x384xf32>
    %21 = vector.extract_strided_slice %14 {offsets = [0, 384], sizes = [8, 128], strides = [1, 1]} : vector<8x512xf32> to vector<8x128xf32>
    %22 = math.tanh %21 : vector<8x128xf32>
    %23 = vector.extract_strided_slice %20 {offsets = [0, 0], sizes = [8, 128], strides = [1, 1]} : vector<8x384xf32> to vector<8x128xf32>
    %24 = vector.extract_strided_slice %20 {offsets = [0, 128], sizes = [8, 128], strides = [1, 1]} : vector<8x384xf32> to vector<8x128xf32>
    %25 = vector.extract_strided_slice %20 {offsets = [0, 256], sizes = [8, 128], strides = [1, 1]} : vector<8x384xf32> to vector<8x128xf32>
    %26 = arith.mulf %24, %11 : vector<8x128xf32>
    %27 = arith.mulf %23, %22 : vector<8x128xf32>
    %28 = arith.addf %26, %27 : vector<8x128xf32>
    %29 = math.tanh %28 : vector<8x128xf32>
    %30 = arith.mulf %25, %29 : vector<8x128xf32>
    %31 = vector.extract_strided_slice %9 {offsets = [8, 0], sizes = [8, 512], strides = [1, 1]} : vector<64x512xf32> to vector<8x512xf32>
    %cst_8 = arith.constant dense<0.000000e+00> : vector<8x512xf32>
    %32 = tpu.matmul %30, %0, %cst_8 {dimension_numbers = #tpu.dot_dimension_numbers<[1], [0], [0], [1], [0, 0, 1, 1], [], []>} : vector<8x128xf32>, vector<128x512xf32>, vector<8x512xf32> -> vector<8x512xf32>
    %33 = arith.addf %31, %32 : vector<8x512xf32>
    %34 = vector.extract_strided_slice %33 {offsets = [0, 0], sizes = [8, 384], strides = [1, 1]} : vector<8x512xf32> to vector<8x384xf32>
    %35 = arith.negf %34 : vector<8x384xf32>
    %36 = math.exp %35 : vector<8x384xf32>
    %cst_9 = arith.constant 1.000000e+00 : f32
    %37 = vector.broadcast %cst_9 : f32 to vector<8x384xf32>
    %38 = arith.addf %37, %36 : vector<8x384xf32>
    %39 = arith.divf %37, %38 : vector<8x384xf32>
    %40 = vector.extract_strided_slice %33 {offsets = [0, 384], sizes = [8, 128], strides = [1, 1]} : vector<8x512xf32> to vector<8x128xf32>
    %41 = math.tanh %40 : vector<8x128xf32>
    %42 = vector.extract_strided_slice %39 {offsets = [0, 0], sizes = [8, 128], strides = [1, 1]} : vector<8x384xf32> to vector<8x128xf32>
    %43 = vector.extract_strided_slice %39 {offsets = [0, 128], sizes = [8, 128], strides = [1, 1]} : vector<8x384xf32> to vector<8x128xf32>
    %44 = vector.extract_strided_slice %39 {offsets = [0, 256], sizes = [8, 128], strides = [1, 1]} : vector<8x384xf32> to vector<8x128xf32>
    %45 = arith.mulf %43, %28 : vector<8x128xf32>
    %46 = arith.mulf %42, %41 : vector<8x128xf32>
    %47 = arith.addf %45, %46 : vector<8x128xf32>
    %48 = math.tanh %47 : vector<8x128xf32>
    %49 = arith.mulf %44, %48 : vector<8x128xf32>
    %50 = vector.extract_strided_slice %9 {offsets = [16, 0], sizes = [8, 512], strides = [1, 1]} : vector<64x512xf32> to vector<8x512xf32>
    %cst_10 = arith.constant dense<0.000000e+00> : vector<8x512xf32>
    %51 = tpu.matmul %49, %0, %cst_10 {dimension_numbers = #tpu.dot_dimension_numbers<[1], [0], [0], [1], [0, 0, 1, 1], [], []>} : vector<8x128xf32>, vector<128x512xf32>, vector<8x512xf32> -> vector<8x512xf32>
    %52 = arith.addf %50, %51 : vector<8x512xf32>
    %53 = vector.extract_strided_slice %52 {offsets = [0, 0], sizes = [8, 384], strides = [1, 1]} : vector<8x512xf32> to vector<8x384xf32>
    %54 = arith.negf %53 : vector<8x384xf32>
    %55 = math.exp %54 : vector<8x384xf32>
    %cst_11 = arith.constant 1.000000e+00 : f32
    %56 = vector.broadcast %cst_11 : f32 to vector<8x384xf32>
    %57 = arith.addf %56, %55 : vector<8x384xf32>
    %58 = arith.divf %56, %57 : vector<8x384xf32>
    %59 = vector.extract_strided_slice %52 {offsets = [0, 384], sizes = [8, 128], strides = [1, 1]} : vector<8x512xf32> to vector<8x128xf32>
    %60 = math.tanh %59 : vector<8x128xf32>
    %61 = vector.extract_strided_slice %58 {offsets = [0, 0], sizes = [8, 128], strides = [1, 1]} : vector<8x384xf32> to vector<8x128xf32>
    %62 = vector.extract_strided_slice %58 {offsets = [0, 128], sizes = [8, 128], strides = [1, 1]} : vector<8x384xf32> to vector<8x128xf32>
    %63 = vector.extract_strided_slice %58 {offsets = [0, 256], sizes = [8, 128], strides = [1, 1]} : vector<8x384xf32> to vector<8x128xf32>
    %64 = arith.mulf %62, %47 : vector<8x128xf32>
    %65 = arith.mulf %61, %60 : vector<8x128xf32>
    %66 = arith.addf %64, %65 : vector<8x128xf32>
    %67 = math.tanh %66 : vector<8x128xf32>
    %68 = arith.mulf %63, %67 : vector<8x128xf32>
    %69 = vector.extract_strided_slice %9 {offsets = [24, 0], sizes = [8, 512], strides = [1, 1]} : vector<64x512xf32> to vector<8x512xf32>
    %cst_12 = arith.constant dense<0.000000e+00> : vector<8x512xf32>
    %70 = tpu.matmul %68, %0, %cst_12 {dimension_numbers = #tpu.dot_dimension_numbers<[1], [0], [0], [1], [0, 0, 1, 1], [], []>} : vector<8x128xf32>, vector<128x512xf32>, vector<8x512xf32> -> vector<8x512xf32>
    %71 = arith.addf %69, %70 : vector<8x512xf32>
    %72 = vector.extract_strided_slice %71 {offsets = [0, 0], sizes = [8, 384], strides = [1, 1]} : vector<8x512xf32> to vector<8x384xf32>
    %73 = arith.negf %72 : vector<8x384xf32>
    %74 = math.exp %73 : vector<8x384xf32>
    %cst_13 = arith.constant 1.000000e+00 : f32
    %75 = vector.broadcast %cst_13 : f32 to vector<8x384xf32>
    %76 = arith.addf %75, %74 : vector<8x384xf32>
    %77 = arith.divf %75, %76 : vector<8x384xf32>
    %78 = vector.extract_strided_slice %71 {offsets = [0, 384], sizes = [8, 128], strides = [1, 1]} : vector<8x512xf32> to vector<8x128xf32>
    %79 = math.tanh %78 : vector<8x128xf32>
    %80 = vector.extract_strided_slice %77 {offsets = [0, 0], sizes = [8, 128], strides = [1, 1]} : vector<8x384xf32> to vector<8x128xf32>
    %81 = vector.extract_strided_slice %77 {offsets = [0, 128], sizes = [8, 128], strides = [1, 1]} : vector<8x384xf32> to vector<8x128xf32>
    %82 = vector.extract_strided_slice %77 {offsets = [0, 256], sizes = [8, 128], strides = [1, 1]} : vector<8x384xf32> to vector<8x128xf32>
    %83 = arith.mulf %81, %66 : vector<8x128xf32>
    %84 = arith.mulf %80, %79 : vector<8x128xf32>
    %85 = arith.addf %83, %84 : vector<8x128xf32>
    %86 = math.tanh %85 : vector<8x128xf32>
    %87 = arith.mulf %82, %86 : vector<8x128xf32>
    %88 = vector.extract_strided_slice %9 {offsets = [32, 0], sizes = [8, 512], strides = [1, 1]} : vector<64x512xf32> to vector<8x512xf32>
    %cst_14 = arith.constant dense<0.000000e+00> : vector<8x512xf32>
    %89 = tpu.matmul %87, %0, %cst_14 {dimension_numbers = #tpu.dot_dimension_numbers<[1], [0], [0], [1], [0, 0, 1, 1], [], []>} : vector<8x128xf32>, vector<128x512xf32>, vector<8x512xf32> -> vector<8x512xf32>
    %90 = arith.addf %88, %89 : vector<8x512xf32>
    %91 = vector.extract_strided_slice %90 {offsets = [0, 0], sizes = [8, 384], strides = [1, 1]} : vector<8x512xf32> to vector<8x384xf32>
    %92 = arith.negf %91 : vector<8x384xf32>
    %93 = math.exp %92 : vector<8x384xf32>
    %cst_15 = arith.constant 1.000000e+00 : f32
    %94 = vector.broadcast %cst_15 : f32 to vector<8x384xf32>
    %95 = arith.addf %94, %93 : vector<8x384xf32>
    %96 = arith.divf %94, %95 : vector<8x384xf32>
    %97 = vector.extract_strided_slice %90 {offsets = [0, 384], sizes = [8, 128], strides = [1, 1]} : vector<8x512xf32> to vector<8x128xf32>
    %98 = math.tanh %97 : vector<8x128xf32>
    %99 = vector.extract_strided_slice %96 {offsets = [0, 0], sizes = [8, 128], strides = [1, 1]} : vector<8x384xf32> to vector<8x128xf32>
    %100 = vector.extract_strided_slice %96 {offsets = [0, 128], sizes = [8, 128], strides = [1, 1]} : vector<8x384xf32> to vector<8x128xf32>
    %101 = vector.extract_strided_slice %96 {offsets = [0, 256], sizes = [8, 128], strides = [1, 1]} : vector<8x384xf32> to vector<8x128xf32>
    %102 = arith.mulf %100, %85 : vector<8x128xf32>
    %103 = arith.mulf %99, %98 : vector<8x128xf32>
    %104 = arith.addf %102, %103 : vector<8x128xf32>
    %105 = math.tanh %104 : vector<8x128xf32>
    %106 = arith.mulf %101, %105 : vector<8x128xf32>
    %107 = vector.extract_strided_slice %9 {offsets = [40, 0], sizes = [8, 512], strides = [1, 1]} : vector<64x512xf32> to vector<8x512xf32>
    %cst_16 = arith.constant dense<0.000000e+00> : vector<8x512xf32>
    %108 = tpu.matmul %106, %0, %cst_16 {dimension_numbers = #tpu.dot_dimension_numbers<[1], [0], [0], [1], [0, 0, 1, 1], [], []>} : vector<8x128xf32>, vector<128x512xf32>, vector<8x512xf32> -> vector<8x512xf32>
    %109 = arith.addf %107, %108 : vector<8x512xf32>
    %110 = vector.extract_strided_slice %109 {offsets = [0, 0], sizes = [8, 384], strides = [1, 1]} : vector<8x512xf32> to vector<8x384xf32>
    %111 = arith.negf %110 : vector<8x384xf32>
    %112 = math.exp %111 : vector<8x384xf32>
    %cst_17 = arith.constant 1.000000e+00 : f32
    %113 = vector.broadcast %cst_17 : f32 to vector<8x384xf32>
    %114 = arith.addf %113, %112 : vector<8x384xf32>
    %115 = arith.divf %113, %114 : vector<8x384xf32>
    %116 = vector.extract_strided_slice %109 {offsets = [0, 384], sizes = [8, 128], strides = [1, 1]} : vector<8x512xf32> to vector<8x128xf32>
    %117 = math.tanh %116 : vector<8x128xf32>
    %118 = vector.extract_strided_slice %115 {offsets = [0, 0], sizes = [8, 128], strides = [1, 1]} : vector<8x384xf32> to vector<8x128xf32>
    %119 = vector.extract_strided_slice %115 {offsets = [0, 128], sizes = [8, 128], strides = [1, 1]} : vector<8x384xf32> to vector<8x128xf32>
    %120 = vector.extract_strided_slice %115 {offsets = [0, 256], sizes = [8, 128], strides = [1, 1]} : vector<8x384xf32> to vector<8x128xf32>
    %121 = arith.mulf %119, %104 : vector<8x128xf32>
    %122 = arith.mulf %118, %117 : vector<8x128xf32>
    %123 = arith.addf %121, %122 : vector<8x128xf32>
    %124 = math.tanh %123 : vector<8x128xf32>
    %125 = arith.mulf %120, %124 : vector<8x128xf32>
    %126 = vector.extract_strided_slice %9 {offsets = [48, 0], sizes = [8, 512], strides = [1, 1]} : vector<64x512xf32> to vector<8x512xf32>
    %cst_18 = arith.constant dense<0.000000e+00> : vector<8x512xf32>
    %127 = tpu.matmul %125, %0, %cst_18 {dimension_numbers = #tpu.dot_dimension_numbers<[1], [0], [0], [1], [0, 0, 1, 1], [], []>} : vector<8x128xf32>, vector<128x512xf32>, vector<8x512xf32> -> vector<8x512xf32>
    %128 = arith.addf %126, %127 : vector<8x512xf32>
    %129 = vector.extract_strided_slice %128 {offsets = [0, 0], sizes = [8, 384], strides = [1, 1]} : vector<8x512xf32> to vector<8x384xf32>
    %130 = arith.negf %129 : vector<8x384xf32>
    %131 = math.exp %130 : vector<8x384xf32>
    %cst_19 = arith.constant 1.000000e+00 : f32
    %132 = vector.broadcast %cst_19 : f32 to vector<8x384xf32>
    %133 = arith.addf %132, %131 : vector<8x384xf32>
    %134 = arith.divf %132, %133 : vector<8x384xf32>
    %135 = vector.extract_strided_slice %128 {offsets = [0, 384], sizes = [8, 128], strides = [1, 1]} : vector<8x512xf32> to vector<8x128xf32>
    %136 = math.tanh %135 : vector<8x128xf32>
    %137 = vector.extract_strided_slice %134 {offsets = [0, 0], sizes = [8, 128], strides = [1, 1]} : vector<8x384xf32> to vector<8x128xf32>
    %138 = vector.extract_strided_slice %134 {offsets = [0, 128], sizes = [8, 128], strides = [1, 1]} : vector<8x384xf32> to vector<8x128xf32>
    %139 = vector.extract_strided_slice %134 {offsets = [0, 256], sizes = [8, 128], strides = [1, 1]} : vector<8x384xf32> to vector<8x128xf32>
    %140 = arith.mulf %138, %123 : vector<8x128xf32>
    %141 = arith.mulf %137, %136 : vector<8x128xf32>
    %142 = arith.addf %140, %141 : vector<8x128xf32>
    %143 = math.tanh %142 : vector<8x128xf32>
    %144 = arith.mulf %139, %143 : vector<8x128xf32>
    %145 = vector.extract_strided_slice %9 {offsets = [56, 0], sizes = [8, 512], strides = [1, 1]} : vector<64x512xf32> to vector<8x512xf32>
    %cst_20 = arith.constant dense<0.000000e+00> : vector<8x512xf32>
    %146 = tpu.matmul %144, %0, %cst_20 {dimension_numbers = #tpu.dot_dimension_numbers<[1], [0], [0], [1], [0, 0, 1, 1], [], []>} : vector<8x128xf32>, vector<128x512xf32>, vector<8x512xf32> -> vector<8x512xf32>
    %147 = arith.addf %145, %146 : vector<8x512xf32>
    %148 = vector.extract_strided_slice %147 {offsets = [0, 0], sizes = [8, 384], strides = [1, 1]} : vector<8x512xf32> to vector<8x384xf32>
    %149 = arith.negf %148 : vector<8x384xf32>
    %150 = math.exp %149 : vector<8x384xf32>
    %cst_21 = arith.constant 1.000000e+00 : f32
    %151 = vector.broadcast %cst_21 : f32 to vector<8x384xf32>
    %152 = arith.addf %151, %150 : vector<8x384xf32>
    %153 = arith.divf %151, %152 : vector<8x384xf32>
    %154 = vector.extract_strided_slice %147 {offsets = [0, 384], sizes = [8, 128], strides = [1, 1]} : vector<8x512xf32> to vector<8x128xf32>
    %155 = math.tanh %154 : vector<8x128xf32>
    %156 = vector.extract_strided_slice %153 {offsets = [0, 0], sizes = [8, 128], strides = [1, 1]} : vector<8x384xf32> to vector<8x128xf32>
    %157 = vector.extract_strided_slice %153 {offsets = [0, 128], sizes = [8, 128], strides = [1, 1]} : vector<8x384xf32> to vector<8x128xf32>
    %158 = vector.extract_strided_slice %153 {offsets = [0, 256], sizes = [8, 128], strides = [1, 1]} : vector<8x384xf32> to vector<8x128xf32>
    %159 = arith.mulf %157, %142 : vector<8x128xf32>
    %160 = arith.mulf %156, %155 : vector<8x128xf32>
    %161 = arith.addf %159, %160 : vector<8x128xf32>
    %162 = math.tanh %161 : vector<8x128xf32>
    %163 = arith.mulf %158, %162 : vector<8x128xf32>
    %c0_22 = arith.constant 0 : index
    %c0_23 = arith.constant 0 : index
    %164 = vector.load %arg3[%c0_22, %c0_23] : memref<128x128xf32, #tpu.memory_space<vmem>>, vector<128x128xf32>
    %cst_24 = arith.constant dense<0.000000e+00> : vector<8x128xf32>
    %165 = tpu.matmul %163, %164, %cst_24 {dimension_numbers = #tpu.dot_dimension_numbers<[1], [0], [0], [1], [0, 0, 1, 1], [], []>} : vector<8x128xf32>, vector<128x128xf32>, vector<8x128xf32> -> vector<8x128xf32>
    %c0_25 = arith.constant 0 : index
    %c0_26 = arith.constant 0 : index
    %166 = vector.load %arg4[%c0_25, %c0_26] : memref<1x128xf32, #tpu.memory_space<vmem>>, vector<1x128xf32>
    %167 = vector.broadcast %166 : vector<1x128xf32> to vector<8x128xf32>
    %168 = arith.addf %165, %167 : vector<8x128xf32>
    %c0_27 = arith.constant 0 : index
    %c0_28 = arith.constant 0 : index
    %169 = vector.load %arg5[%c0_27, %c0_28] : memref<8x128xf32, #tpu.memory_space<vmem>>, vector<8x128xf32>
    tpu.vector_store %arg5[%c0_27, %c0_28], %168 {strides = array<i32>} : memref<8x128xf32, #tpu.memory_space<vmem>>, vector<8x128xf32>,
    return
  }
}

</mosaic_0001>

<bundles_post_ra>
// kernel: tpu_custom_call.1
= control target key start
LH: loop header
LB: loop body
LE: loop exit
PB: predicated region body
PF: predicated region fallthrough
CT: control target
= control target key end

     0   :  { %10 = vsyncpa [#allocation3], 0  ;;  %s3149_s0 = inlined_call_operand.vmem [shape: f32[64,1], index: 0, kind: input, shape index: {}]   ;;  %s3150_s1 = inlined_call_operand.vmem [shape: f32[2,512], index: 1, kind: input, shape index: {}]   ;;  %s3151_s2 = inlined_call_operand.hbm [shape: f32[128,512], index: 2, kind: input, shape index: {}]   ;;  %s3152_s3 = inlined_call_operand.hbm [shape: f32[128,128], index: 3, kind: input, shape index: {}]   ;;  %s3153_s4 = inlined_call_operand.vmem [shape: f32[1,128], index: 4, kind: input, shape index: {}]   ;;  %s3154_s5 = inlined_call_operand.hbm [shape: f32[8,128], index: 5, kind: output, shape index: {}]  }
   0x1   :  { %11 = vsyncpa [#allocation6], 0 }
   0x2   :  { %12 = vsyncpa [#allocation4], 0  ;;  %s2595_s18 = smov [#allocation2]   ;;  %s2523_s22 = scalar_lea.hbm %s3151_s2, 8192 }
   0x3   :  { %s22_s19 = sshll.u32 %s2595_s18, 4  ;;  %p2524_p0 = scmp.ne.s32.totalorder %s3151_s2, %s2523_s22  ;;  %s23_s19 = int_to_ptr.vmem [resolvable:$true] %s22_s19 }
   0x4   :  { %p2527_p1 = scmp.lt.u32.totalorder %s2523_s22, %s3151_s2 }
   0x6   :  { %p2529_p2 = pnand %p2527_p1, %p2524_p0 }
   0x8   :  { %2532 = shalt.err (!%p2529_p2)
}
   0x9   :  { %s2533_s27 = scalar_lea.vmem %s23_s19, 8192  ;;  %p2538_p4 = scmp.lt.s32.totalorder %s23_s19, %s23_s19 }
   0xa   :  { %p2534_p3 = scmp.ne.s32.totalorder %s23_s19, %s2533_s27  ;;  %p2539_p5 = scmp.lt.s32.totalorder %s2533_s27, %s2533_s27 }
   0xc   :  { %p2540_p6 = por %p2539_p5, %p2538_p4 }
   0xe   :  { %p2541_p7 = pnand %p2540_p6, %p2534_p3 }
  0x10   :  { %2544 = shalt.err (!%p2541_p7)
}
  0x11   :  { %s2596_s28 = smov 512   ;;  %s2597_s29 = smov 32  }
  0x12   :  { %28 = dma.hbm_to_vmem [thread:$0]  %s3151_s2, 8192, %s23_s19, [#allocation3], %s2596_s28, %s2596_s28, %s2597_s29  }
  0x13   :  { %s2598_s7 = smov [#allocation5]   ;;  %s2545_s11 = scalar_lea.hbm %s3152_s3, 2048 }
  0x14   :  { %s34_s8 = sshll.u32 %s2598_s7, 4  ;;  %p2546_p8 = scmp.ne.s32.totalorder %s3152_s3, %s2545_s11  ;;  %s35_s8 = int_to_ptr.vmem [resolvable:$true] %s34_s8 }
  0x15   :  { %p2549_p9 = scmp.lt.u32.totalorder %s2545_s11, %s3152_s3 }
  0x17   :  { %p2551_p10 = pnand %p2549_p9, %p2546_p8 }
  0x19   :  { %2554 = shalt.err (!%p2551_p10)
}
  0x1a   :  { %s2555_s16 = scalar_lea.vmem %s35_s8, 2048  ;;  %p2560_p12 = scmp.lt.s32.totalorder %s35_s8, %s35_s8 }
  0x1b   :  { %p2556_p11 = scmp.ne.s32.totalorder %s35_s8, %s2555_s16  ;;  %p2561_p13 = scmp.lt.s32.totalorder %s2555_s16, %s2555_s16 }
  0x1d   :  { %p2562_p0 = por %p2561_p13, %p2560_p12 }
  0x1f   :  { %p2563_p1 = pnand %p2562_p0, %p2556_p11 }
  0x21   :  { %2566 = shalt.err (!%p2563_p1)
}
  0x22   :  { %s2599_s2 = smov 128   ;;  %s2600_s17 = smov 8  }
  0x23   :  { %40 = dma.hbm_to_vmem [thread:$0]  %s3152_s3, 2048, %s35_s8, [#allocation6], %s2599_s2, %s2599_s2, %s2600_s17  }
  0x24   :  { %2589 = dma.done.wait [#allocation3], 8192  }
  0x25   :  { %2590 = vsyncadd [#allocation3], 4294959104 }
  0x26   :  { %2591 = dma.done.wait [#allocation6], 2048  }
  0x27   :  { %2592 = vsyncadd [#allocation6], 4294965248  ;;  %v2601_v0 = vmov 0.0   ;;  %v2602_v1 = vmov 0   ;;  %v50_v2 = vld [vmem:[#allocation2 + $0x8] sm:$0xff]  ;;  %v52_v4 = vld [vmem:[#allocation2 + $0x18] sm:$0xff] }
  0x28   :  { %363 = vmatprep.mubr.f32.mxu0 %v2601_v0  ;;  %434 = vmatprep.mubr.f32.mxu1 %v2601_v0  ;;  %v54_v3 = vld [vmem:[#allocation2 + $0x28] sm:$0xff]  ;;  %v56_v6 = vld [vmem:[#allocation2 + $0x38] sm:$0xff]  ;;  %v49_v7 = vld [vmem:[#allocation2] sm:$0xff]  ;;  %vm2604_vm0 = vmmov 0   ;;  %s2605_s12 = smov [#allocation7]  }
  0x29   :  { %2393 = vset.pattern.permute.xlu0 %v2602_v1  ;;  %2394 = vset.pattern.permute.xlu1 %v2602_v1  ;;  %v2662_v5 = vpack.c.bf16 %v54_v3, %v50_v2  ;;  %v53_v8 = vld [vmem:[#allocation2 + $0x20] sm:$0xff]  ;;  %v2664_v9 = vpack.c.bf16 %v56_v6, %v52_v4  ;;  %v51_v11 = vld [vmem:[#allocation2 + $0x10] sm:$0xff]  ;;  %v58_v13 = vld [vmem:[#allocation2 + $0x48] sm:$0xff]  ;;  %s1759_s13 = sshll.u32 %s2605_s12, 4  ;;  %s1760_s13 = int_to_ptr.vmem [resolvable:$true] %s1759_s13 }
  0x2a   :  { %v2666_v10 = vpack.c.bf16 %v53_v8, %v49_v7  ;;  %v55_v12 = vld [vmem:[#allocation2 + $0x30] sm:$0xff]  ;;  %v62_v15 = vld [vmem:[#allocation2 + $0x68] sm:$0xff]  ;;  %v60_v16 = vld [vmem:[#allocation2 + $0x58] sm:$0xff]  ;;  %s2567_s14 = scalar_lea.vmem %s1760_s13, 128  ;;  %p2572_p3 = scmp.lt.s32.totalorder %s1760_s13, %s1760_s13 }
  0x2b   :  { %1847 = vmatprep.subr.bf16.mxu0 %v2662_v5  ;;  %v2669_v14 = vpack.c.bf16 %v55_v12, %v51_v11  ;;  %v64_v17 = vld [vmem:[#allocation2 + $0x78] sm:$0xff]  ;;  %1879 = vmatprep.subr.bf16.mxu1 %v2664_v9  ;;  %v2673_v18 = vpack.c.bf16 %v62_v15, %v58_v13  ;;  %v57_v20 = vld [vmem:[#allocation2 + $0x40] sm:$0xff]  ;;  %v59_v22 = vld [vmem:[#allocation2 + $0x50] sm:$0xff]  ;;  %p2568_p2 = scmp.ne.s32.totalorder %s1760_s13, %s2567_s14  ;;  %p2573_p4 = scmp.lt.s32.totalorder %s2567_s14, %s2567_s14 }
  0x2c   :  { %1849 = vmatpush1.bf16.msra.mxu0 %v2666_v10  ;;  %v2675_v19 = vpack.c.bf16 %v64_v17, %v60_v16  ;;  %v61_v21 = vld [vmem:[#allocation2 + $0x60] sm:$0xff]  ;;  %v63_v24 = vld [vmem:[#allocation2 + $0x70] sm:$0xff]  ;;  %v66_v25 = vld [vmem:[#allocation2 + $0x88] sm:$0xff] }
  0x2d   :  { %1881 = vmatpush1.bf16.msra.mxu1 %v2669_v14  ;;  %v2678_v23 = vpack.c.bf16 %v61_v21, %v57_v20  ;;  %v70_v26 = vld [vmem:[#allocation2 + $0xa8] sm:$0xff]  ;;  %1851 = vmatprep.subr.bf16.mxu0 %v2673_v18  ;;  %v2682_v27 = vpack.c.bf16 %v63_v24, %v59_v22  ;;  %v68_v29 = vld [vmem:[#allocation2 + $0x98] sm:$0xff]  ;;  %v65_v31 = vld [vmem:[#allocation2 + $0x80] sm:$0xff]  ;;  %p2574_p5 = por %p2573_p4, %p2572_p3 }
  0x2e   :  { %1883 = vmatprep.subr.bf16.mxu1 %v2675_v19  ;;  %v2684_v28 = vpack.c.bf16 %v70_v26, %v66_v25  ;;  %v72_v30 = vld [vmem:[#allocation2 + $0xb8] sm:$0xff]  ;;  %v69_v33 = vld [vmem:[#allocation2 + $0xa0] sm:$0xff]  ;;  %v67_v34 = vld [vmem:[#allocation2 + $0x90] sm:$0xff] }
  0x2f   :  { %v2686_v32 = vpack.c.bf16 %v72_v30, %v68_v29  ;;  %v71_v35 = vld [vmem:[#allocation2 + $0xb0] sm:$0xff]  ;;  %v2689_v36 = vpack.c.bf16 %v69_v33, %v65_v31  ;;  %v74_v37 = vld [vmem:[#allocation2 + $0xc8] sm:$0xff]  ;;  %v76_v39 = vld [vmem:[#allocation2 + $0xd8] sm:$0xff]  ;;  %p2575_p6 = pnand %p2574_p5, %p2568_p2 }
  0x30   :  { %1853 = vmatpush1.bf16.msra.mxu0 %v2678_v23  ;;  %v78_v38 = vld [vmem:[#allocation2 + $0xe8] sm:$0xff]  ;;  %v2693_v40 = vpack.c.bf16 %v71_v35, %v67_v34  ;;  %v80_v42 = vld [vmem:[#allocation2 + $0xf8] sm:$0xff]  ;;  %v73_v43 = vld [vmem:[#allocation2 + $0xc0] sm:$0xff] }
  0x31   :  { %1885 = vmatpush1.bf16.msra.mxu1 %v2682_v27  ;;  %1855 = vmatprep.subr.bf16.mxu0 %v2684_v28  ;;  %v2695_v41 = vpack.c.bf16 %v78_v38, %v74_v37  ;;  %v77_v44 = vld [vmem:[#allocation2 + $0xe0] sm:$0xff]  ;;  %v2698_v45 = vpack.c.bf16 %v80_v42, %v76_v39  ;;  %v75_v46 = vld [vmem:[#allocation2 + $0xd0] sm:$0xff]  ;;  %v82_v48 = vld [vmem:[#allocation2 + $0x108] sm:$0xff] }
  0x32   :  { %1887 = vmatprep.subr.bf16.mxu1 %v2686_v32  ;;  %v79_v47 = vld [vmem:[#allocation2 + $0xf0] sm:$0xff]  ;;  %v86_v49 = vld [vmem:[#allocation2 + $0x128] sm:$0xff]  ;;  %v84_v50 = vld [vmem:[#allocation2 + $0x118] sm:$0xff]  ;;  %v2701_v52 = vpack.c.bf16 %v77_v44, %v73_v43 }
  0x33   :  { %v88_v51 = vld [vmem:[#allocation2 + $0x138] sm:$0xff]  ;;  %v2705_v53 = vpack.c.bf16 %v79_v47, %v75_v46  ;;  %v2707_v54 = vpack.c.bf16 %v86_v49, %v82_v48  ;;  %v81_v55 = vld [vmem:[#allocation2 + $0x100] sm:$0xff]  ;;  %v83_v57 = vld [vmem:[#allocation2 + $0x110] sm:$0xff] }
  0x34   :  { %1857 = vmatpush1.bf16.msra.mxu0 %v2689_v36  ;;  %v85_v56 = vld [vmem:[#allocation2 + $0x120] sm:$0xff]  ;;  %v2710_v58 = vpack.c.bf16 %v88_v51, %v84_v50  ;;  %v87_v59 = vld [vmem:[#allocation2 + $0x130] sm:$0xff]  ;;  %v90_v60 = vld [vmem:[#allocation2 + $0x148] sm:$0xff] }
  0x35   :  { %1889 = vmatpush1.bf16.msra.mxu1 %v2693_v40  ;;  %1859 = vmatprep.subr.bf16.mxu0 %v2695_v41  ;;  %v94_v61 = vld [vmem:[#allocation2 + $0x168] sm:$0xff]  ;;  %v92_v62 = vld [vmem:[#allocation2 + $0x158] sm:$0xff]  ;;  %v2713_v1 = vpack.c.bf16 %v85_v56, %v81_v55  ;;  %v2717_v2 = vpack.c.bf16 %v87_v59, %v83_v57  ;;  %v89_v4 = vld [vmem:[#allocation2 + $0x140] sm:$0xff]  ;;  %v163_v56 = vlaneseq }
  0x36   :  { %1891 = vmatprep.subr.bf16.mxu1 %v2698_v45  ;;  %v96_v63 = vld [vmem:[#allocation2 + $0x178] sm:$0xff]  ;;  %v2719_v3 = vpack.c.bf16 %v94_v61, %v90_v60  ;;  %v93_v6 = vld [vmem:[#allocation2 + $0x160] sm:$0xff]  ;;  %v91_v7 = vld [vmem:[#allocation2 + $0x150] sm:$0xff] }
  0x37   :  { %v2722_v8 = vpack.c.bf16 %v96_v63, %v92_v62  ;;  %v95_v11 = vld [vmem:[#allocation2 + $0x170] sm:$0xff]  ;;  %v98_v12 = vld [vmem:[#allocation2 + $0x188] sm:$0xff]  ;;  %v100_v15 = vld [vmem:[#allocation2 + $0x198] sm:$0xff]  ;;  %v2725_v17 = vpack.c.bf16 %v93_v6, %v89_v4  ;;  %v164_v57 = vshrl.u32 %v163_v56, 7 }
  0x38   :  { %1861 = vmatpush1.bf16.msra.mxu0 %v2701_v52  ;;  %v102_v13 = vld [vmem:[#allocation2 + $0x1a8] sm:$0xff]  ;;  %v104_v16 = vld [vmem:[#allocation2 + $0x1b8] sm:$0xff]  ;;  %v97_v20 = vld [vmem:[#allocation2 + $0x180] sm:$0xff]  ;;  %v2729_v21 = vpack.c.bf16 %v95_v11, %v91_v7 }
  0x39   :  { %1893 = vmatpush1.bf16.msra.mxu1 %v2705_v53  ;;  %1863 = vmatprep.subr.bf16.mxu0 %v2707_v54  ;;  %v2731_v22 = vpack.c.bf16 %v102_v13, %v98_v12  ;;  %v101_v24 = vld [vmem:[#allocation2 + $0x1a0] sm:$0xff]  ;;  %v99_v25 = vld [vmem:[#allocation2 + $0x190] sm:$0xff]  ;;  %v2737_v29 = vpack.c.bf16 %v104_v16, %v100_v15  ;;  %v106_v31 = vld [vmem:[#allocation2 + $0x1c8] sm:$0xff]  ;;  %v165_v59 = vsub.s32 0, %v164_v57  ;;  %v169_v60 = vsub.s32 2, %v164_v57 }
  0x3a   :  { %1895 = vmatprep.subr.bf16.mxu1 %v2710_v58  ;;  %v114_v26 = vld [vmem:[%s3149_s0] sm:$0xff]  ;;  %v103_v30 = vld [vmem:[#allocation2 + $0x1b0] sm:$0xff]  ;;  %v110_v33 = vld [vmem:[#allocation2 + $0x1e8] sm:$0xff]  ;;  %v2743_v38 = vpack.c.bf16 %v101_v24, %v97_v20  ;;  %v233_v63 = vsub.s32 1, %v164_v57  ;;  %v237_v6 = vsub.s32 3, %v164_v57  ;;  %v173_v7 = vsub.s32 4, %v164_v57 }
  0x3b   :  { %124 = vperm.xlu0 %2393, %v114_v26   ;;  %v108_v34 = vld [vmem:[#allocation2 + $0x1d8] sm:$0xff]  ;;  %v115_v37 = vld [vmem:[%s3149_s0 + $0x8] sm:$0xff]  ;;  %v2747_v39 = vpack.c.bf16 %v103_v30, %v99_v25  ;;  %v2749_v42 = vpack.c.bf16 %v110_v33, %v106_v31  ;;  %v105_v43 = vld [vmem:[#allocation2 + $0x1c0] sm:$0xff]  ;;  %v241_v24 = vsub.s32 5, %v164_v57  ;;  %v177_v25 = vsub.s32 6, %v164_v57 }
  0x3c   :  { %1865 = vmatpush1.bf16.msra.mxu0 %v2713_v1  ;;  %v112_v35 = vld [vmem:[#allocation2 + $0x1f8] sm:$0xff]  ;;  %v109_v44 = vld [vmem:[#allocation2 + $0x1e0] sm:$0xff]  ;;  %v107_v47 = vld [vmem:[#allocation2 + $0x1d0] sm:$0xff] }
  0x3d   :  { %1897 = vmatpush1.bf16.msra.mxu1 %v2717_v2  ;;  %1867 = vmatprep.subr.bf16.mxu0 %v2719_v3  ;;  %v2752_v46 = vpack.c.bf16 %v112_v35, %v108_v34  ;;  %v111_v48 = vld [vmem:[#allocation2 + $0x1f0] sm:$0xff]  ;;  %v118_v49 = vld [vmem:[%s3149_s0 + $0x20] sm:$0xff]  ;;  %v2758_v50 = vpack.c.bf16 %v109_v44, %v105_v43  ;;  %v245_v44 = vsub.s32 7, %v164_v57 }
  0x3e   :  { %1899 = vmatprep.subr.bf16.mxu1 %v2722_v8  ;;  %v2762_v51 = vpack.c.bf16 %v111_v48, %v107_v47  ;;  %v120_v55 = vld [vmem:[%s3149_s0 + $0x30] sm:$0xff]  ;;  %v113_v61 = vld [vmem:[%s3150_s1] sm:$0xff] }
  0x3f   :  { %129 = vperm.xlu0 %2393, %v115_v37   ;;  %v166_v62 = vrot.slane %v113_v61, %v165_v59  ;;  %v170_v4 = vrot.slane %v113_v61, %v169_v60  ;;  %v234_v12 = vrot.slane %v113_v61, %v233_v63  ;;  %v238_v15 = vrot.slane %v113_v61, %v237_v6 }
  0x40   :  { %1869 = vmatpush1.bf16.msra.mxu0 %v2725_v17  ;;  %v174_v20 = vrot.slane %v113_v61, %v173_v7  ;;  %v242_v35 = vrot.slane %v113_v61, %v241_v24  ;;  %v178_v37 = vrot.slane %v113_v61, %v177_v25  ;;  %v246_v6 = vrot.slane %v113_v61, %v245_v44 }
  0x41   :  { %1901 = vmatpush1.bf16.msra.mxu1 %v2729_v21  ;;  %1871 = vmatprep.subr.bf16.mxu0 %v2731_v22  ;;  %v2811_v11 = vrot.slane %v166_v62, %v165_v59  ;;  %v2813_v13 = vrot.slane %v170_v4, %v165_v59  ;;  %v2816_v30 = vrot.slane %v234_v12, %v233_v63 }
  0x42   :  { %1903 = vmatprep.subr.bf16.mxu1 %v2737_v29  ;;  %v2819_v33 = vrot.slane %v238_v15, %v233_v63  ;;  %v2821_v34 = vrot.slane %v174_v20, %v165_v59  ;;  %v2828_v56 = vrot.slane %v178_v37, %v165_v59  ;;  %v2832_v25 = vrot.slane %v246_v6, %v233_v63 }
  0x43   :  { %144 = vperm.xlu0 %2393, %v118_v49  }
  0x44   :  { %1873 = vmatpush1.bf16.msra.mxu0 %v2743_v38 }
  0x45   :  { %1905 = vmatpush1.bf16.msra.mxu1 %v2747_v39  ;;  %1875 = vmatprep.subr.bf16.mxu0 %v2749_v42 }
  0x46   :  { %1907 = vmatprep.subr.bf16.mxu1 %v2752_v46 }
  0x47   :  { %154 = vperm.xlu0 %2393, %v120_v55   ;;  %v2826_v55 = vrot.slane %v242_v35, %v233_v63 }
  0x48   :  { %1877 = vmatpush1.bf16.msra.mxu0 %v2758_v50 }
  0x49   :  { %1909 = vmatpush1.bf16.msra.mxu1 %v2762_v51  ;;  %1911 = vmatprep.subr.bf16.mxu0 %v2662_v5 }
  0x4a   :  { %1943 = vmatprep.subr.bf16.mxu1 %v2664_v9 }
  0x4b   :  { %364 = vmatmul.mubr.f32.vlgmr.msra.gmra.mrb[0].mxu0 %v2601_v0 }
  0x4c   :  { %435 = vmatmul.mubr.f32.vlgmr.msra.gmra.mrb[0].mxu1 %v2601_v0  ;;  %1913 = vmatpush1.bf16.msra.mxu0 %v2666_v10 }
  0x4d   :  { %1945 = vmatpush1.bf16.msra.mxu1 %v2669_v14  ;;  %1915 = vmatprep.subr.bf16.mxu0 %v2673_v18 }
  0x4e   :  { %1947 = vmatprep.subr.bf16.mxu1 %v2675_v19  ;;  %533 = vmatprep.mubr.f32.mxu0 %v2601_v0 }
  0x4f   :  { %604 = vmatprep.mubr.f32.mxu1 %v2601_v0 }
  0x50   :  { %1917 = vmatpush1.bf16.msra.mxu0 %v2678_v23 }
  0x51   :  { %1949 = vmatpush1.bf16.msra.mxu1 %v2682_v27  ;;  %1919 = vmatprep.subr.bf16.mxu0 %v2684_v28 }
  0x52   :  { %1951 = vmatprep.subr.bf16.mxu1 %v2686_v32 }
  0x54   :  { %1921 = vmatpush1.bf16.msra.mxu0 %v2689_v36 }
  0x55   :  { %1953 = vmatpush1.bf16.msra.mxu1 %v2693_v40  ;;  %1923 = vmatprep.subr.bf16.mxu0 %v2695_v41 }
  0x56   :  { %1955 = vmatprep.subr.bf16.mxu1 %v2698_v45 }
  0x58   :  { %1925 = vmatpush1.bf16.msra.mxu0 %v2701_v52 }
  0x59   :  { %1957 = vmatpush1.bf16.msra.mxu1 %v2705_v53  ;;  %1927 = vmatprep.subr.bf16.mxu0 %v2707_v54 }
  0x5a   :  { %1959 = vmatprep.subr.bf16.mxu1 %v2710_v58 }
  0x5c   :  { %1929 = vmatpush1.bf16.msra.mxu0 %v2713_v1 }
  0x5d   :  { %1961 = vmatpush1.bf16.msra.mxu1 %v2717_v2  ;;  %1931 = vmatprep.subr.bf16.mxu0 %v2719_v3 }
  0x5e   :  { %1963 = vmatprep.subr.bf16.mxu1 %v2722_v8 }
  0x60   :  { %1933 = vmatpush1.bf16.msra.mxu0 %v2725_v17 }
  0x61   :  { %1965 = vmatpush1.bf16.msra.mxu1 %v2729_v21  ;;  %1935 = vmatprep.subr.bf16.mxu0 %v2731_v22 }
  0x62   :  { %1967 = vmatprep.subr.bf16.mxu1 %v2737_v29 }
  0x64   :  { %1937 = vmatpush1.bf16.msra.mxu0 %v2743_v38 }
  0x65   :  { %1969 = vmatpush1.bf16.msra.mxu1 %v2747_v39  ;;  %1939 = vmatprep.subr.bf16.mxu0 %v2749_v42 }
  0x66   :  { %1971 = vmatprep.subr.bf16.mxu1 %v2752_v46 }
  0x68   :  { %1941 = vmatpush1.bf16.msra.mxu0 %v2758_v50 }
  0x69   :  { %1973 = vmatpush1.bf16.msra.mxu1 %v2762_v51  ;;  %1975 = vmatprep.subr.bf16.mxu0 %v2662_v5 }
  0x6a   :  { %2007 = vmatprep.subr.bf16.mxu1 %v2664_v9 }
  0xba   :  { %v125_v16 = vpop.permute.xlu0 %124 }
  0xbb   :  { %v199_v26 = vmul.f32 %v2811_v11, %v125_v16  ;;  %v200_v31 = vmul.f32 %v2813_v13, %v125_v16  ;;  %v201_v49 = vmul.f32 %v2821_v34, %v125_v16  ;;  %v202_v57 = vmul.f32 %v2828_v56, %v125_v16 }
  0xbd   :  { %v267_v43 = vadd.f32 %v2816_v30, %v199_v26  ;;  %v268_v47 = vadd.f32 %v2819_v33, %v200_v31  ;;  %v269_v20 = vadd.f32 %v2826_v55, %v201_v49  ;;  %v270_v59 = vadd.f32 %v2832_v25, %v202_v57  ;;  %v121_v57 = vld [vmem:[%s3149_s0 + $0x38] sm:$0xff] }
 0x11e   :  { %v365_v48 = vpop.f32.mrb[0].mxu0 }
 0x11f   :  { %v441_v60 = vadd.f32 %v365_v48, %v267_v43  ;;  %v436_v62 = vpop.f32.mrb[0].mxu1  ;;  %v367_v4 = vpop.f32.mrb[1].mxu0 }
 0x120   :  { %v442_v7 = vadd.f32 %v367_v4, %v268_v47  ;;  %v438_v12 = vpop.f32.mrb[1].mxu1  ;;  %v443_v26 = vadd.f32 %v436_v62, %v269_v20  ;;  %v117_v20 = vld [vmem:[%s3149_s0 + $0x18] sm:$0xff] }
 0x121   :  { %v1769_v15 = vmul.f32 -1.442695, %v441_v60  ;;  %v444_v35 = vadd.f32 %v438_v12, %v270_v59 }
 0x122   :  { %v1770_v24 = vmul.f32 -1.442695, %v442_v7  ;;  %v1771_v31 = vmul.f32 -1.442695, %v443_v26  ;;  %v130_v26 = vpop.permute.xlu0 %129 }
 0x123   :  { %2395 = vpow2.f32 %v1769_v15  ;;  %v116_v15 = vld [vmem:[%s3149_s0 + $0x10] sm:$0xff]  ;;  %v203_v59 = vmul.f32 %v2811_v11, %v130_v26 }
 0x124   :  { %2397 = vpow2.f32 %v1770_v24  ;;  %134 = vperm.xlu1 %2394, %v116_v15   ;;  %v119_v24 = vld [vmem:[%s3149_s0 + $0x28] sm:$0xff] }
 0x125   :  { %2399 = vpow2.f32 %v1771_v31  ;;  %v204_v31 = vmul.f32 %v2813_v13, %v130_v26 }
 0x126   :  { %2401 = vtanh.f32 %v444_v35  ;;  %v271_v35 = vadd.f32 %v2816_v30, %v203_v59 }
 0x128   :  { %139 = vperm.xlu1 %2394, %v117_v20  }
 0x12c   :  { %149 = vperm.xlu1 %2394, %v119_v24  }
 0x12d   :  { %v2396_v37 = vpop.eup %2395 }
 0x12e   :  { %v454_v43 = vadd.f32 1.0, %v2396_v37  ;;  %v2398_v61 = vpop.eup %2397 }
 0x12f   :  { %v455_v44 = vadd.f32 1.0, %v2398_v61  ;;  %v2400_v47 = vpop.eup %2399  ;;  %v272_v61 = vadd.f32 %v2819_v33, %v204_v31 }
 0x130   :  { %2403 = vrcp.f32 %v454_v43  ;;  %v2402_v48 = vpop.eup %2401  ;;  %v456_v60 = vadd.f32 1.0, %v2400_v47  ;;  %159 = vperm.xlu1 %2394, %v121_v57  }
 0x131   :  { %2405 = vrcp.f32 %v455_v44 }
 0x132   :  { %2407 = vrcp.f32 %v456_v60 }
 0x13a   :  { %v2404_v49 = vpop.eup %2403 }
 0x13b   :  { %v465_v16 = vmul.f32 %v2404_v49, %v2402_v48  ;;  %v2406_v63 = vpop.eup %2405 }
 0x13c   :  { %v464_v4 = vmul.f32 0.0, %v2406_v63  ;;  %v2408_v6 = vpop.eup %2407  ;;  %v205_v63 = vmul.f32 %v2821_v34, %v130_v26 }
 0x13e   :  { %v2835_v62 = vadd.f32 %v465_v16, %v464_v4  ;;  %v206_v4 = vmul.f32 %v2828_v56, %v130_v26 }
 0x140   :  { %2409 = vtanh.f32 %v2835_v62 }
 0x14a   :  { %v2410_v7 = vpop.eup %2409 }
 0x14b   :  { %v468_v12 = vmul.f32 %v2410_v7, %v2408_v6  ;;  %v273_v6 = vadd.f32 %v2826_v55, %v205_v63 }
 0x14d   :  { %534 = vmatmul.mubr.f32.vlgmr.msra.gmra.mrb[2].mxu0 %v468_v12  ;;  %605 = vmatmul.mubr.f32.vlgmr.msra.gmra.mrb[2].mxu1 %v468_v12  ;;  %v274_v12 = vadd.f32 %v2832_v25, %v206_v4 }
 0x14e   :  { %1977 = vmatpush1.bf16.msra.mxu0 %v2666_v10  ;;  %2009 = vmatpush1.bf16.msra.mxu1 %v2669_v14 }
 0x14f   :  { %1979 = vmatprep.subr.bf16.mxu0 %v2673_v18  ;;  %2011 = vmatprep.subr.bf16.mxu1 %v2675_v19 }
 0x150   :  { %703 = vmatprep.mubr.f32.mxu0 %v2601_v0  ;;  %774 = vmatprep.mubr.f32.mxu1 %v2601_v0 }
 0x152   :  { %1981 = vmatpush1.bf16.msra.mxu0 %v2678_v23  ;;  %2013 = vmatpush1.bf16.msra.mxu1 %v2682_v27 }
 0x153   :  { %1983 = vmatprep.subr.bf16.mxu0 %v2684_v28  ;;  %2015 = vmatprep.subr.bf16.mxu1 %v2686_v32 }
 0x156   :  { %1985 = vmatpush1.bf16.msra.mxu0 %v2689_v36  ;;  %2017 = vmatpush1.bf16.msra.mxu1 %v2693_v40 }
 0x157   :  { %1987 = vmatprep.subr.bf16.mxu0 %v2695_v41  ;;  %2019 = vmatprep.subr.bf16.mxu1 %v2698_v45 }
 0x15a   :  { %1989 = vmatpush1.bf16.msra.mxu0 %v2701_v52  ;;  %2021 = vmatpush1.bf16.msra.mxu1 %v2705_v53 }
 0x15b   :  { %1991 = vmatprep.subr.bf16.mxu0 %v2707_v54  ;;  %2023 = vmatprep.subr.bf16.mxu1 %v2710_v58 }
 0x15e   :  { %1993 = vmatpush1.bf16.msra.mxu0 %v2713_v1  ;;  %2025 = vmatpush1.bf16.msra.mxu1 %v2717_v2 }
 0x15f   :  { %1995 = vmatprep.subr.bf16.mxu0 %v2719_v3  ;;  %2027 = vmatprep.subr.bf16.mxu1 %v2722_v8 }
 0x162   :  { %1997 = vmatpush1.bf16.msra.mxu0 %v2725_v17  ;;  %2029 = vmatpush1.bf16.msra.mxu1 %v2729_v21 }
 0x163   :  { %1999 = vmatprep.subr.bf16.mxu0 %v2731_v22  ;;  %2031 = vmatprep.subr.bf16.mxu1 %v2737_v29 }
 0x166   :  { %2001 = vmatpush1.bf16.msra.mxu0 %v2743_v38  ;;  %2033 = vmatpush1.bf16.msra.mxu1 %v2747_v39 }
 0x167   :  { %2003 = vmatprep.subr.bf16.mxu0 %v2749_v42  ;;  %2035 = vmatprep.subr.bf16.mxu1 %v2752_v46 }
 0x16a   :  { %2005 = vmatpush1.bf16.msra.mxu0 %v2758_v50  ;;  %2037 = vmatpush1.bf16.msra.mxu1 %v2762_v51 }
 0x16b   :  { %2039 = vmatprep.subr.bf16.mxu0 %v2662_v5  ;;  %2071 = vmatprep.subr.bf16.mxu1 %v2664_v9 }
 0x220   :  { %v535_v37 = vpop.f32.mrb[2].mxu0  ;;  %v606_v43 = vpop.f32.mrb[2].mxu1 }
 0x221   :  { %v611_v44 = vadd.f32 %v535_v37, %v271_v35  ;;  %v537_v47 = vpop.f32.mrb[3].mxu0  ;;  %v608_v48 = vpop.f32.mrb[3].mxu1  ;;  %v613_v7 = vadd.f32 %v606_v43, %v273_v6 }
 0x222   :  { %v612_v49 = vadd.f32 %v537_v47, %v272_v61  ;;  %v614_v15 = vadd.f32 %v608_v48, %v274_v12 }
 0x223   :  { %v1772_v16 = vmul.f32 -1.442695, %v611_v44  ;;  %v1774_v20 = vmul.f32 -1.442695, %v613_v7 }
 0x224   :  { %v1773_v60 = vmul.f32 -1.442695, %v612_v49 }
 0x225   :  { %2411 = vpow2.f32 %v1772_v16 }
 0x226   :  { %2413 = vpow2.f32 %v1773_v60 }
 0x227   :  { %2415 = vtanh.f32 %v614_v15 }
 0x228   :  { %2417 = vpow2.f32 %v1774_v20 }
 0x22f   :  { %v2412_v24 = vpop.eup %2411 }
 0x230   :  { %v624_v57 = vadd.f32 1.0, %v2412_v24  ;;  %v2414_v59 = vpop.eup %2413 }
 0x231   :  { %v625_v31 = vadd.f32 1.0, %v2414_v59  ;;  %v2416_v35 = vpop.eup %2415 }
 0x232   :  { %2419 = vrcp.f32 %v624_v57  ;;  %v2418_v37 = vpop.eup %2417 }
 0x233   :  { %2421 = vrcp.f32 %v625_v31  ;;  %v626_v47 = vadd.f32 1.0, %v2418_v37 }
 0x235   :  { %2423 = vrcp.f32 %v626_v47 }
 0x23c   :  { %v2420_v61 = vpop.eup %2419 }
 0x23d   :  { %v635_v26 = vmul.f32 %v2420_v61, %v2416_v35  ;;  %v2422_v44 = vpop.eup %2421 }
 0x23e   :  { %v634_v43 = vmul.f32 %v2422_v44, %v2835_v62  ;;  %v135_v62 = vpop.permute.xlu1 %134 }
 0x23f   :  { %v2424_v48 = vpop.eup %2423  ;;  %v207_v60 = vmul.f32 %v2811_v11, %v135_v62  ;;  %v208_v4 = vmul.f32 %v2813_v13, %v135_v62  ;;  %v209_v24 = vmul.f32 %v2821_v34, %v135_v62  ;;  %v210_v61 = vmul.f32 %v2828_v56, %v135_v62 }
 0x240   :  { %v2893_v49 = vadd.f32 %v635_v26, %v634_v43 }
 0x241   :  { %v275_v6 = vadd.f32 %v2816_v30, %v207_v60  ;;  %v276_v7 = vadd.f32 %v2819_v33, %v208_v4  ;;  %v277_v26 = vadd.f32 %v2826_v55, %v209_v24  ;;  %v278_v44 = vadd.f32 %v2832_v25, %v210_v61 }
 0x242   :  { %2425 = vtanh.f32 %v2893_v49 }
 0x24c   :  { %v2426_v16 = vpop.eup %2425 }
 0x24d   :  { %v638_v63 = vmul.f32 %v2426_v16, %v2424_v48 }
 0x24f   :  { %704 = vmatmul.mubr.f32.vlgmr.msra.gmra.mrb[4].mxu0 %v638_v63  ;;  %775 = vmatmul.mubr.f32.vlgmr.msra.gmra.mrb[4].mxu1 %v638_v63 }
 0x250   :  { %2041 = vmatpush1.bf16.msra.mxu0 %v2666_v10  ;;  %2073 = vmatpush1.bf16.msra.mxu1 %v2669_v14 }
 0x251   :  { %2043 = vmatprep.subr.bf16.mxu0 %v2673_v18  ;;  %2075 = vmatprep.subr.bf16.mxu1 %v2675_v19 }
 0x252   :  { %873 = vmatprep.mubr.f32.mxu0 %v2601_v0  ;;  %944 = vmatprep.mubr.f32.mxu1 %v2601_v0 }
 0x254   :  { %2045 = vmatpush1.bf16.msra.mxu0 %v2678_v23  ;;  %2077 = vmatpush1.bf16.msra.mxu1 %v2682_v27 }
 0x255   :  { %2047 = vmatprep.subr.bf16.mxu0 %v2684_v28  ;;  %2079 = vmatprep.subr.bf16.mxu1 %v2686_v32 }
 0x258   :  { %2049 = vmatpush1.bf16.msra.mxu0 %v2689_v36  ;;  %2081 = vmatpush1.bf16.msra.mxu1 %v2693_v40 }
 0x259   :  { %2051 = vmatprep.subr.bf16.mxu0 %v2695_v41  ;;  %2083 = vmatprep.subr.bf16.mxu1 %v2698_v45 }
 0x25c   :  { %2053 = vmatpush1.bf16.msra.mxu0 %v2701_v52  ;;  %2085 = vmatpush1.bf16.msra.mxu1 %v2705_v53 }
 0x25d   :  { %2055 = vmatprep.subr.bf16.mxu0 %v2707_v54  ;;  %2087 = vmatprep.subr.bf16.mxu1 %v2710_v58 }
 0x260   :  { %2057 = vmatpush1.bf16.msra.mxu0 %v2713_v1  ;;  %2089 = vmatpush1.bf16.msra.mxu1 %v2717_v2 }
 0x261   :  { %2059 = vmatprep.subr.bf16.mxu0 %v2719_v3  ;;  %2091 = vmatprep.subr.bf16.mxu1 %v2722_v8 }
 0x264   :  { %2061 = vmatpush1.bf16.msra.mxu0 %v2725_v17  ;;  %2093 = vmatpush1.bf16.msra.mxu1 %v2729_v21 }
 0x265   :  { %2063 = vmatprep.subr.bf16.mxu0 %v2731_v22  ;;  %2095 = vmatprep.subr.bf16.mxu1 %v2737_v29 }
 0x268   :  { %2065 = vmatpush1.bf16.msra.mxu0 %v2743_v38  ;;  %2097 = vmatpush1.bf16.msra.mxu1 %v2747_v39 }
 0x269   :  { %2067 = vmatprep.subr.bf16.mxu0 %v2749_v42  ;;  %2099 = vmatprep.subr.bf16.mxu1 %v2752_v46 }
 0x26c   :  { %2069 = vmatpush1.bf16.msra.mxu0 %v2758_v50  ;;  %2101 = vmatpush1.bf16.msra.mxu1 %v2762_v51 }
 0x26d   :  { %2103 = vmatprep.subr.bf16.mxu0 %v2662_v5  ;;  %2135 = vmatprep.subr.bf16.mxu1 %v2664_v9 }
 0x322   :  { %v705_v12 = vpop.f32.mrb[4].mxu0  ;;  %v776_v15 = vpop.f32.mrb[4].mxu1 }
 0x323   :  { %v781_v20 = vadd.f32 %v705_v12, %v275_v6  ;;  %v707_v57 = vpop.f32.mrb[5].mxu0  ;;  %v778_v59 = vpop.f32.mrb[5].mxu1  ;;  %v783_v47 = vadd.f32 %v776_v15, %v277_v26 }
 0x324   :  { %v782_v31 = vadd.f32 %v707_v57, %v276_v7  ;;  %v784_v43 = vadd.f32 %v778_v59, %v278_v44 }
 0x325   :  { %v1775_v35 = vmul.f32 -1.442695, %v781_v20  ;;  %v1777_v48 = vmul.f32 -1.442695, %v783_v47 }
 0x326   :  { %v1776_v37 = vmul.f32 -1.442695, %v782_v31 }
 0x327   :  { %2427 = vpow2.f32 %v1775_v35 }
 0x328   :  { %2429 = vpow2.f32 %v1776_v37 }
 0x329   :  { %2431 = vtanh.f32 %v784_v43 }
 0x32a   :  { %2433 = vpow2.f32 %v1777_v48 }
 0x331   :  { %v2428_v16 = vpop.eup %2427 }
 0x332   :  { %v794_v63 = vadd.f32 1.0, %v2428_v16  ;;  %v2430_v60 = vpop.eup %2429 }
 0x333   :  { %v795_v4 = vadd.f32 1.0, %v2430_v60  ;;  %v2432_v6 = vpop.eup %2431 }
 0x334   :  { %2435 = vrcp.f32 %v794_v63  ;;  %v2434_v7 = vpop.eup %2433 }
 0x335   :  { %2437 = vrcp.f32 %v795_v4  ;;  %v796_v24 = vadd.f32 1.0, %v2434_v7 }
 0x337   :  { %2439 = vrcp.f32 %v796_v24 }
 0x33e   :  { %v2436_v62 = vpop.eup %2435 }
 0x33f   :  { %v805_v12 = vmul.f32 %v2436_v62, %v2432_v6  ;;  %v2438_v20 = vpop.eup %2437 }
 0x340   :  { %v804_v57 = vmul.f32 %v2438_v20, %v2893_v49  ;;  %v140_v49 = vpop.permute.xlu1 %139 }
 0x341   :  { %v2440_v15 = vpop.eup %2439  ;;  %v211_v37 = vmul.f32 %v2811_v11, %v140_v49  ;;  %v212_v61 = vmul.f32 %v2813_v13, %v140_v49  ;;  %v213_v6 = vmul.f32 %v2821_v34, %v140_v49  ;;  %v214_v62 = vmul.f32 %v2828_v56, %v140_v49 }
 0x342   :  { %v2939_v31 = vadd.f32 %v805_v12, %v804_v57 }
 0x343   :  { %v279_v26 = vadd.f32 %v2816_v30, %v211_v37  ;;  %v280_v43 = vadd.f32 %v2819_v33, %v212_v61  ;;  %v281_v12 = vadd.f32 %v2826_v55, %v213_v6  ;;  %v282_v24 = vadd.f32 %v2832_v25, %v214_v62 }
 0x344   :  { %2441 = vtanh.f32 %v2939_v31 }
 0x34e   :  { %v2442_v59 = vpop.eup %2441 }
 0x34f   :  { %v808_v35 = vmul.f32 %v2442_v59, %v2440_v15 }
 0x351   :  { %874 = vmatmul.mubr.f32.vlgmr.msra.gmra.mrb[6].mxu0 %v808_v35  ;;  %945 = vmatmul.mubr.f32.vlgmr.msra.gmra.mrb[6].mxu1 %v808_v35 }
 0x352   :  { %2105 = vmatpush1.bf16.msra.mxu0 %v2666_v10  ;;  %2137 = vmatpush1.bf16.msra.mxu1 %v2669_v14 }
 0x353   :  { %2107 = vmatprep.subr.bf16.mxu0 %v2673_v18  ;;  %2139 = vmatprep.subr.bf16.mxu1 %v2675_v19 }
 0x354   :  { %1043 = vmatprep.mubr.f32.mxu0 %v2601_v0  ;;  %1114 = vmatprep.mubr.f32.mxu1 %v2601_v0 }
 0x356   :  { %2109 = vmatpush1.bf16.msra.mxu0 %v2678_v23  ;;  %2141 = vmatpush1.bf16.msra.mxu1 %v2682_v27 }
 0x357   :  { %2111 = vmatprep.subr.bf16.mxu0 %v2684_v28  ;;  %2143 = vmatprep.subr.bf16.mxu1 %v2686_v32 }
 0x35a   :  { %2113 = vmatpush1.bf16.msra.mxu0 %v2689_v36  ;;  %2145 = vmatpush1.bf16.msra.mxu1 %v2693_v40 }
 0x35b   :  { %2115 = vmatprep.subr.bf16.mxu0 %v2695_v41  ;;  %2147 = vmatprep.subr.bf16.mxu1 %v2698_v45 }
 0x35e   :  { %2117 = vmatpush1.bf16.msra.mxu0 %v2701_v52  ;;  %2149 = vmatpush1.bf16.msra.mxu1 %v2705_v53 }
 0x35f   :  { %2119 = vmatprep.subr.bf16.mxu0 %v2707_v54  ;;  %2151 = vmatprep.subr.bf16.mxu1 %v2710_v58 }
 0x362   :  { %2121 = vmatpush1.bf16.msra.mxu0 %v2713_v1  ;;  %2153 = vmatpush1.bf16.msra.mxu1 %v2717_v2 }
 0x363   :  { %2123 = vmatprep.subr.bf16.mxu0 %v2719_v3  ;;  %2155 = vmatprep.subr.bf16.mxu1 %v2722_v8 }
 0x366   :  { %2125 = vmatpush1.bf16.msra.mxu0 %v2725_v17  ;;  %2157 = vmatpush1.bf16.msra.mxu1 %v2729_v21 }
 0x367   :  { %2127 = vmatprep.subr.bf16.mxu0 %v2731_v22  ;;  %2159 = vmatprep.subr.bf16.mxu1 %v2737_v29 }
 0x36a   :  { %2129 = vmatpush1.bf16.msra.mxu0 %v2743_v38  ;;  %2161 = vmatpush1.bf16.msra.mxu1 %v2747_v39 }
 0x36b   :  { %2131 = vmatprep.subr.bf16.mxu0 %v2749_v42  ;;  %2163 = vmatprep.subr.bf16.mxu1 %v2752_v46 }
 0x36e   :  { %2133 = vmatpush1.bf16.msra.mxu0 %v2758_v50  ;;  %2165 = vmatpush1.bf16.msra.mxu1 %v2762_v51 }
 0x36f   :  { %2167 = vmatprep.subr.bf16.mxu0 %v2662_v5  ;;  %2199 = vmatprep.subr.bf16.mxu1 %v2664_v9 }
 0x424   :  { %v875_v44 = vpop.f32.mrb[6].mxu0  ;;  %v946_v47 = vpop.f32.mrb[6].mxu1 }
 0x425   :  { %v951_v48 = vadd.f32 %v875_v44, %v279_v26  ;;  %v877_v16 = vpop.f32.mrb[7].mxu0  ;;  %v948_v63 = vpop.f32.mrb[7].mxu1  ;;  %v953_v20 = vadd.f32 %v946_v47, %v281_v12 }
 0x426   :  { %v952_v60 = vadd.f32 %v877_v16, %v280_v43  ;;  %v954_v57 = vadd.f32 %v948_v63, %v282_v24 }
 0x427   :  { %v1778_v4 = vmul.f32 -1.442695, %v951_v48  ;;  %v1780_v15 = vmul.f32 -1.442695, %v953_v20 }
 0x428   :  { %v1779_v7 = vmul.f32 -1.442695, %v952_v60 }
 0x429   :  { %2443 = vpow2.f32 %v1778_v4 }
 0x42a   :  { %2445 = vpow2.f32 %v1779_v7 }
 0x42b   :  { %2447 = vtanh.f32 %v954_v57 }
 0x42c   :  { %2449 = vpow2.f32 %v1780_v15 }
 0x433   :  { %v2444_v59 = vpop.eup %2443 }
 0x434   :  { %v964_v35 = vadd.f32 1.0, %v2444_v59  ;;  %v2446_v37 = vpop.eup %2445 }
 0x435   :  { %v965_v61 = vadd.f32 1.0, %v2446_v37  ;;  %v2448_v26 = vpop.eup %2447 }
 0x436   :  { %2451 = vrcp.f32 %v964_v35  ;;  %v2450_v44 = vpop.eup %2449 }
 0x437   :  { %2453 = vrcp.f32 %v965_v61  ;;  %v966_v16 = vadd.f32 1.0, %v2450_v44 }
 0x439   :  { %2455 = vrcp.f32 %v966_v16 }
 0x440   :  { %v2452_v43 = vpop.eup %2451 }
 0x441   :  { %v975_v49 = vmul.f32 %v2452_v43, %v2448_v26  ;;  %v2454_v48 = vpop.eup %2453 }
 0x442   :  { %v974_v47 = vmul.f32 %v2454_v48, %v2939_v31  ;;  %v145_v31 = vpop.permute.xlu0 %144 }
 0x443   :  { %v2456_v63 = vpop.eup %2455  ;;  %v215_v7 = vmul.f32 %v2811_v11, %v145_v31  ;;  %v216_v62 = vmul.f32 %v2813_v13, %v145_v31  ;;  %v217_v26 = vmul.f32 %v2821_v34, %v145_v31  ;;  %v218_v43 = vmul.f32 %v2828_v56, %v145_v31 }
 0x444   :  { %v2985_v60 = vadd.f32 %v975_v49, %v974_v47 }
 0x445   :  { %v283_v12 = vadd.f32 %v2816_v30, %v215_v7  ;;  %v284_v57 = vadd.f32 %v2819_v33, %v216_v62  ;;  %v285_v49 = vadd.f32 %v2826_v55, %v217_v26  ;;  %v286_v16 = vadd.f32 %v2832_v25, %v218_v43 }
 0x446   :  { %2457 = vtanh.f32 %v2985_v60 }
 0x450   :  { %v2458_v4 = vpop.eup %2457 }
 0x451   :  { %v978_v6 = vmul.f32 %v2458_v4, %v2456_v63 }
 0x453   :  { %1044 = vmatmul.mubr.f32.vlgmr.msra.gmra.mrb[8].mxu0 %v978_v6  ;;  %1115 = vmatmul.mubr.f32.vlgmr.msra.gmra.mrb[8].mxu1 %v978_v6 }
 0x454   :  { %2169 = vmatpush1.bf16.msra.mxu0 %v2666_v10  ;;  %2201 = vmatpush1.bf16.msra.mxu1 %v2669_v14 }
 0x455   :  { %2171 = vmatprep.subr.bf16.mxu0 %v2673_v18  ;;  %2203 = vmatprep.subr.bf16.mxu1 %v2675_v19 }
 0x456   :  { %1213 = vmatprep.mubr.f32.mxu0 %v2601_v0  ;;  %1284 = vmatprep.mubr.f32.mxu1 %v2601_v0 }
 0x458   :  { %2173 = vmatpush1.bf16.msra.mxu0 %v2678_v23  ;;  %2205 = vmatpush1.bf16.msra.mxu1 %v2682_v27 }
 0x459   :  { %2175 = vmatprep.subr.bf16.mxu0 %v2684_v28  ;;  %2207 = vmatprep.subr.bf16.mxu1 %v2686_v32 }
 0x45c   :  { %2177 = vmatpush1.bf16.msra.mxu0 %v2689_v36  ;;  %2209 = vmatpush1.bf16.msra.mxu1 %v2693_v40 }
 0x45d   :  { %2179 = vmatprep.subr.bf16.mxu0 %v2695_v41  ;;  %2211 = vmatprep.subr.bf16.mxu1 %v2698_v45 }
 0x460   :  { %2181 = vmatpush1.bf16.msra.mxu0 %v2701_v52  ;;  %2213 = vmatpush1.bf16.msra.mxu1 %v2705_v53 }
 0x461   :  { %2183 = vmatprep.subr.bf16.mxu0 %v2707_v54  ;;  %2215 = vmatprep.subr.bf16.mxu1 %v2710_v58 }
 0x464   :  { %2185 = vmatpush1.bf16.msra.mxu0 %v2713_v1  ;;  %2217 = vmatpush1.bf16.msra.mxu1 %v2717_v2 }
 0x465   :  { %2187 = vmatprep.subr.bf16.mxu0 %v2719_v3  ;;  %2219 = vmatprep.subr.bf16.mxu1 %v2722_v8 }
 0x468   :  { %2189 = vmatpush1.bf16.msra.mxu0 %v2725_v17  ;;  %2221 = vmatpush1.bf16.msra.mxu1 %v2729_v21 }
 0x469   :  { %2191 = vmatprep.subr.bf16.mxu0 %v2731_v22  ;;  %2223 = vmatprep.subr.bf16.mxu1 %v2737_v29 }
 0x46c   :  { %2193 = vmatpush1.bf16.msra.mxu0 %v2743_v38  ;;  %2225 = vmatpush1.bf16.msra.mxu1 %v2747_v39 }
 0x46d   :  { %2195 = vmatprep.subr.bf16.mxu0 %v2749_v42  ;;  %2227 = vmatprep.subr.bf16.mxu1 %v2752_v46 }
 0x470   :  { %2197 = vmatpush1.bf16.msra.mxu0 %v2758_v50  ;;  %2229 = vmatpush1.bf16.msra.mxu1 %v2762_v51 }
 0x471   :  { %2231 = vmatprep.subr.bf16.mxu0 %v2662_v5  ;;  %2263 = vmatprep.subr.bf16.mxu1 %v2664_v9 }
 0x526   :  { %v1045_v20 = vpop.f32.mrb[8].mxu0  ;;  %v1116_v24 = vpop.f32.mrb[8].mxu1 }
 0x527   :  { %v1121_v15 = vadd.f32 %v1045_v20, %v283_v12  ;;  %v1047_v59 = vpop.f32.mrb[9].mxu0  ;;  %v1118_v35 = vpop.f32.mrb[9].mxu1  ;;  %v1123_v48 = vadd.f32 %v1116_v24, %v285_v49 }
 0x528   :  { %v1122_v37 = vadd.f32 %v1047_v59, %v284_v57  ;;  %v1124_v47 = vadd.f32 %v1118_v35, %v286_v16 }
 0x529   :  { %v1781_v61 = vmul.f32 -1.442695, %v1121_v15  ;;  %v1783_v63 = vmul.f32 -1.442695, %v1123_v48 }
 0x52a   :  { %v1782_v44 = vmul.f32 -1.442695, %v1122_v37 }
 0x52b   :  { %2459 = vpow2.f32 %v1781_v61 }
 0x52c   :  { %2461 = vpow2.f32 %v1782_v44 }
 0x52d   :  { %2463 = vtanh.f32 %v1124_v47 }
 0x52e   :  { %2465 = vpow2.f32 %v1783_v63 }
 0x535   :  { %v2460_v4 = vpop.eup %2459 }
 0x536   :  { %v1134_v6 = vadd.f32 1.0, %v2460_v4  ;;  %v2462_v7 = vpop.eup %2461 }
 0x537   :  { %v1135_v62 = vadd.f32 1.0, %v2462_v7  ;;  %v2464_v12 = vpop.eup %2463 }
 0x538   :  { %2467 = vrcp.f32 %v1134_v6  ;;  %v2466_v20 = vpop.eup %2465 }
 0x539   :  { %2469 = vrcp.f32 %v1135_v62  ;;  %v1136_v59 = vadd.f32 1.0, %v2466_v20 }
 0x53b   :  { %2471 = vrcp.f32 %v1136_v59 }
 0x542   :  { %v2468_v57 = vpop.eup %2467 }
 0x543   :  { %v1145_v31 = vmul.f32 %v2468_v57, %v2464_v12  ;;  %v2470_v15 = vpop.eup %2469 }
 0x544   :  { %v1144_v24 = vmul.f32 %v2470_v15, %v2985_v60  ;;  %v150_v60 = vpop.permute.xlu1 %149 }
 0x545   :  { %v2472_v35 = vpop.eup %2471  ;;  %v219_v44 = vmul.f32 %v2811_v11, %v150_v60  ;;  %v220_v43 = vmul.f32 %v2813_v13, %v150_v60 }
 0x546   :  { %v3031_v37 = vadd.f32 %v1145_v31, %v1144_v24 }
 0x547   :  { %v287_v49 = vadd.f32 %v2816_v30, %v219_v44  ;;  %v288_v47 = vadd.f32 %v2819_v33, %v220_v43 }
 0x548   :  { %2473 = vtanh.f32 %v3031_v37 }
 0x552   :  { %v2474_v61 = vpop.eup %2473 }
 0x553   :  { %v1148_v26 = vmul.f32 %v2474_v61, %v2472_v35 }
 0x555   :  { %1214 = vmatmul.mubr.f32.vlgmr.msra.gmra.mrb[10].mxu0 %v1148_v26  ;;  %1285 = vmatmul.mubr.f32.vlgmr.msra.gmra.mrb[10].mxu1 %v1148_v26 }
 0x556   :  { %2233 = vmatpush1.bf16.msra.mxu0 %v2666_v10  ;;  %2265 = vmatpush1.bf16.msra.mxu1 %v2669_v14 }
 0x557   :  { %2235 = vmatprep.subr.bf16.mxu0 %v2673_v18  ;;  %2267 = vmatprep.subr.bf16.mxu1 %v2675_v19 }
 0x558   :  { %1383 = vmatprep.mubr.f32.mxu0 %v2601_v0  ;;  %1454 = vmatprep.mubr.f32.mxu1 %v2601_v0 }
 0x55a   :  { %2237 = vmatpush1.bf16.msra.mxu0 %v2678_v23  ;;  %2269 = vmatpush1.bf16.msra.mxu1 %v2682_v27 }
 0x55b   :  { %2239 = vmatprep.subr.bf16.mxu0 %v2684_v28  ;;  %2271 = vmatprep.subr.bf16.mxu1 %v2686_v32 }
 0x55e   :  { %2241 = vmatpush1.bf16.msra.mxu0 %v2689_v36  ;;  %2273 = vmatpush1.bf16.msra.mxu1 %v2693_v40 }
 0x55f   :  { %2243 = vmatprep.subr.bf16.mxu0 %v2695_v41  ;;  %2275 = vmatprep.subr.bf16.mxu1 %v2698_v45 }
 0x562   :  { %2245 = vmatpush1.bf16.msra.mxu0 %v2701_v52  ;;  %2277 = vmatpush1.bf16.msra.mxu1 %v2705_v53 }
 0x563   :  { %2247 = vmatprep.subr.bf16.mxu0 %v2707_v54  ;;  %2279 = vmatprep.subr.bf16.mxu1 %v2710_v58 }
 0x566   :  { %2249 = vmatpush1.bf16.msra.mxu0 %v2713_v1  ;;  %2281 = vmatpush1.bf16.msra.mxu1 %v2717_v2 }
 0x567   :  { %2251 = vmatprep.subr.bf16.mxu0 %v2719_v3  ;;  %2283 = vmatprep.subr.bf16.mxu1 %v2722_v8 }
 0x56a   :  { %2253 = vmatpush1.bf16.msra.mxu0 %v2725_v17  ;;  %2285 = vmatpush1.bf16.msra.mxu1 %v2729_v21 }
 0x56b   :  { %2255 = vmatprep.subr.bf16.mxu0 %v2731_v22  ;;  %2287 = vmatprep.subr.bf16.mxu1 %v2737_v29 }
 0x56e   :  { %2257 = vmatpush1.bf16.msra.mxu0 %v2743_v38  ;;  %2289 = vmatpush1.bf16.msra.mxu1 %v2747_v39 }
 0x56f   :  { %2259 = vmatprep.subr.bf16.mxu0 %v2749_v42  ;;  %2291 = vmatprep.subr.bf16.mxu1 %v2752_v46 }
 0x572   :  { %2261 = vmatpush1.bf16.msra.mxu0 %v2758_v50  ;;  %2293 = vmatpush1.bf16.msra.mxu1 %v2762_v51 }
 0x573   :  { %2295 = vmatprep.subr.bf16.mxu0 %v2662_v5  ;;  %2327 = vmatprep.subr.bf16.mxu1 %v2664_v9  ;;  %v221_v5 = vmul.f32 %v2821_v34, %v150_v60  ;;  %v222_v9 = vmul.f32 %v2828_v56, %v150_v60 }
 0x575   :  { %v289_v20 = vadd.f32 %v2826_v55, %v221_v5  ;;  %v290_v31 = vadd.f32 %v2832_v25, %v222_v9 }
 0x628   :  { %v1215_v48 = vpop.f32.mrb[10].mxu0  ;;  %v1286_v16 = vpop.f32.mrb[10].mxu1 }
 0x629   :  { %v1291_v63 = vadd.f32 %v1215_v48, %v287_v49  ;;  %v1217_v4 = vpop.f32.mrb[11].mxu0  ;;  %v1288_v6 = vpop.f32.mrb[11].mxu1  ;;  %v1293_v57 = vadd.f32 %v1286_v16, %v289_v20  ;;  %v1659_v20 = vld [vmem:[#allocation5] sm:$0xff] }
 0x62a   :  { %v1292_v7 = vadd.f32 %v1217_v4, %v288_v47  ;;  %v1294_v15 = vadd.f32 %v1288_v6, %v290_v31 }
 0x62b   :  { %v1784_v62 = vmul.f32 -1.442695, %v1291_v63  ;;  %v1786_v59 = vmul.f32 -1.442695, %v1293_v57  ;;  %v1660_v57 = vld [vmem:[#allocation5 + $0x8] sm:$0xff] }
 0x62c   :  { %v1785_v12 = vmul.f32 -1.442695, %v1292_v7  ;;  %v2359_v31 = vpack.c.bf16 %v1660_v57, %v1659_v20 }
 0x62d   :  { %2475 = vpow2.f32 %v1784_v62 }
 0x62e   :  { %2477 = vpow2.f32 %v1785_v12 }
 0x62f   :  { %2479 = vtanh.f32 %v1294_v15  ;;  %v2603_v15 = vmov 0.0|0.0  }
 0x630   :  { %2481 = vpow2.f32 %v1786_v59  ;;  %v1661_v59 = vld [vmem:[#allocation5 + $0x10] sm:$0xff] }
 0x637   :  { %v2476_v24 = vpop.eup %2475 }
 0x638   :  { %v1304_v35 = vadd.f32 1.0, %v2476_v24  ;;  %v2478_v61 = vpop.eup %2477  ;;  %v1662_v24 = vld [vmem:[#allocation5 + $0x18] sm:$0xff] }
 0x639   :  { %v1305_v26 = vadd.f32 1.0, %v2478_v61  ;;  %v2480_v44 = vpop.eup %2479  ;;  %v1663_v61 = vld [vmem:[#allocation5 + $0x20] sm:$0xff] }
 0x63a   :  { %2483 = vrcp.f32 %v1304_v35  ;;  %v2482_v43 = vpop.eup %2481  ;;  %v2362_v35 = vpack.c.bf16 %v1662_v24, %v1661_v59 }
 0x63b   :  { %2485 = vrcp.f32 %v1305_v26  ;;  %v1306_v47 = vadd.f32 1.0, %v2482_v43  ;;  %v1664_v26 = vld [vmem:[#allocation5 + $0x28] sm:$0xff]  ;;  %v1665_v43 = vld [vmem:[#allocation5 + $0x30] sm:$0xff] }
 0x63d   :  { %2487 = vrcp.f32 %v1306_v47  ;;  %v1668_v47 = vld [vmem:[#allocation5 + $0x48] sm:$0xff] }
 0x644   :  { %v2484_v49 = vpop.eup %2483 }
 0x645   :  { %v1315_v60 = vmul.f32 %v2484_v49, %v2480_v44  ;;  %v2486_v48 = vpop.eup %2485  ;;  %v2365_v44 = vpack.c.bf16 %v1664_v26, %v1663_v61  ;;  %v1666_v49 = vld [vmem:[#allocation5 + $0x38] sm:$0xff] }
 0x646   :  { %v1314_v16 = vmul.f32 %v2486_v48, %v3031_v37  ;;  %v1667_v48 = vld [vmem:[#allocation5 + $0x40] sm:$0xff] }
 0x647   :  { %v2488_v4 = vpop.eup %2487 }
 0x648   :  { %v3077_v63 = vadd.f32 %v1315_v60, %v1314_v16  ;;  %v2368_v60 = vpack.c.bf16 %v1666_v49, %v1665_v43  ;;  %v2371_v16 = vpack.c.bf16 %v1668_v47, %v1667_v48 }
 0x64a   :  { %2489 = vtanh.f32 %v3077_v63 }
 0x654   :  { %v2490_v6 = vpop.eup %2489 }
 0x655   :  { %v1318_v7 = vmul.f32 %v2490_v6, %v2488_v4  ;;  %v1670_v4 = vld [vmem:[#allocation5 + $0x58] sm:$0xff] }
 0x657   :  { %1384 = vmatmul.mubr.f32.vlgmr.msra.gmra.mrb[12].mxu0 %v1318_v7  ;;  %1455 = vmatmul.mubr.f32.vlgmr.msra.gmra.mrb[12].mxu1 %v1318_v7  ;;  %v1671_v7 = vld [vmem:[#allocation5 + $0x60] sm:$0xff] }
 0x658   :  { %2297 = vmatpush1.bf16.msra.mxu0 %v2666_v10  ;;  %2329 = vmatpush1.bf16.msra.mxu1 %v2669_v14  ;;  %v155_v10 = vpop.permute.xlu0 %154 }
 0x659   :  { %2299 = vmatprep.subr.bf16.mxu0 %v2673_v18  ;;  %2331 = vmatprep.subr.bf16.mxu1 %v2675_v19  ;;  %v223_v14 = vmul.f32 %v2811_v11, %v155_v10  ;;  %v224_v18 = vmul.f32 %v2813_v13, %v155_v10 }
 0x65a   :  { %1553 = vmatprep.mubr.f32.mxu0 %v2601_v0  ;;  %1624 = vmatprep.mubr.f32.mxu1 %v2601_v0 }
 0x65b   :  { %v291_v19 = vadd.f32 %v2816_v30, %v223_v14 }
 0x65c   :  { %2301 = vmatpush1.bf16.msra.mxu0 %v2678_v23  ;;  %2333 = vmatpush1.bf16.msra.mxu1 %v2682_v27 }
 0x65d   :  { %2303 = vmatprep.subr.bf16.mxu0 %v2684_v28  ;;  %2335 = vmatprep.subr.bf16.mxu1 %v2686_v32  ;;  %v292_v28 = vadd.f32 %v2819_v33, %v224_v18  ;;  %v1673_v18 = vld [vmem:[#allocation5 + $0x70] sm:$0xff] }
 0x660   :  { %2305 = vmatpush1.bf16.msra.mxu0 %v2689_v36  ;;  %2337 = vmatpush1.bf16.msra.mxu1 %v2693_v40 }
 0x661   :  { %2307 = vmatprep.subr.bf16.mxu0 %v2695_v41  ;;  %2339 = vmatprep.subr.bf16.mxu1 %v2698_v45  ;;  %v225_v45 = vmul.f32 %v2821_v34, %v155_v10 }
 0x664   :  { %2309 = vmatpush1.bf16.msra.mxu0 %v2701_v52  ;;  %2341 = vmatpush1.bf16.msra.mxu1 %v2705_v53 }
 0x665   :  { %2311 = vmatprep.subr.bf16.mxu0 %v2707_v54  ;;  %2343 = vmatprep.subr.bf16.mxu1 %v2710_v58  ;;  %v226_v54 = vmul.f32 %v2828_v56, %v155_v10  ;;  %v293_v58 = vadd.f32 %v2826_v55, %v225_v45  ;;  %v1672_v10 = vld [vmem:[#allocation5 + $0x68] sm:$0xff] }
 0x666   :  { %v2377_v14 = vpack.c.bf16 %v1672_v10, %v1671_v7 }
 0x668   :  { %2313 = vmatpush1.bf16.msra.mxu0 %v2713_v1  ;;  %2345 = vmatpush1.bf16.msra.mxu1 %v2717_v2  ;;  %v294_v2 = vadd.f32 %v2832_v25, %v226_v54 }
 0x669   :  { %2315 = vmatprep.subr.bf16.mxu0 %v2719_v3  ;;  %2347 = vmatprep.subr.bf16.mxu1 %v2722_v8 }
 0x66c   :  { %2317 = vmatpush1.bf16.msra.mxu0 %v2725_v17  ;;  %2349 = vmatpush1.bf16.msra.mxu1 %v2729_v21 }
 0x66d   :  { %2319 = vmatprep.subr.bf16.mxu0 %v2731_v22  ;;  %2351 = vmatprep.subr.bf16.mxu1 %v2737_v29 }
 0x670   :  { %2321 = vmatpush1.bf16.msra.mxu0 %v2743_v38  ;;  %2353 = vmatpush1.bf16.msra.mxu1 %v2747_v39 }
 0x671   :  { %2323 = vmatprep.subr.bf16.mxu0 %v2749_v42  ;;  %2355 = vmatprep.subr.bf16.mxu1 %v2752_v46 }
 0x674   :  { %2325 = vmatpush1.bf16.msra.mxu0 %v2758_v50  ;;  %2357 = vmatpush1.bf16.msra.mxu1 %v2762_v51 }
 0x675   :  { %2358 = vmatprep.subr.bf16.mxu0 %v2603_v15 }
 0x72a   :  { %v1385_v23 = vpop.f32.mrb[12].mxu0  ;;  %v1456_v27 = vpop.f32.mrb[12].mxu1 }
 0x72b   :  { %v1461_v32 = vadd.f32 %v1385_v23, %v291_v19  ;;  %v1387_v36 = vpop.f32.mrb[13].mxu0  ;;  %v1458_v40 = vpop.f32.mrb[13].mxu1  ;;  %v1463_v1 = vadd.f32 %v1456_v27, %v293_v58  ;;  %v1674_v19 = vld [vmem:[#allocation5 + $0x78] sm:$0xff] }
 0x72c   :  { %v1462_v41 = vadd.f32 %v1387_v36, %v292_v28  ;;  %v1464_v3 = vadd.f32 %v1458_v40, %v294_v2  ;;  %v2380_v23 = vpack.c.bf16 %v1674_v19, %v1673_v18  ;;  %v160_v27 = vpop.permute.xlu1 %159 }
 0x72d   :  { %v1787_v52 = vmul.f32 -1.442695, %v1461_v32  ;;  %v1789_v8 = vmul.f32 -1.442695, %v1463_v1  ;;  %v227_v28 = vmul.f32 %v2811_v11, %v160_v27  ;;  %v228_v32 = vmul.f32 %v2813_v13, %v160_v27 }
 0x72e   :  { %v1788_v53 = vmul.f32 -1.442695, %v1462_v41  ;;  %v229_v58 = vmul.f32 %v2821_v34, %v160_v27 }
 0x72f   :  { %2491 = vpow2.f32 %v1787_v52  ;;  %v295_v36 = vadd.f32 %v2816_v30, %v227_v28 }
 0x730   :  { %2493 = vpow2.f32 %v1788_v53  ;;  %v297_v11 = vadd.f32 %v2826_v55, %v229_v58 }
 0x731   :  { %2495 = vtanh.f32 %v1464_v3  ;;  %v230_v3 = vmul.f32 %v2828_v56, %v160_v27 }
 0x732   :  { %2497 = vpow2.f32 %v1789_v8 }
 0x733   :  { %v298_v30 = vadd.f32 %v2832_v25, %v230_v3 }
 0x739   :  { %v2492_v17 = vpop.eup %2491 }
 0x73a   :  { %v1474_v21 = vadd.f32 1.0, %v2492_v17  ;;  %v2494_v22 = vpop.eup %2493 }
 0x73b   :  { %v1475_v29 = vadd.f32 1.0, %v2494_v22  ;;  %v2496_v38 = vpop.eup %2495 }
 0x73c   :  { %2499 = vrcp.f32 %v1474_v21  ;;  %v2498_v39 = vpop.eup %2497 }
 0x73d   :  { %2501 = vrcp.f32 %v1475_v29  ;;  %v1476_v51 = vadd.f32 1.0, %v2498_v39 }
 0x73f   :  { %2503 = vrcp.f32 %v1476_v51 }
 0x746   :  { %v2500_v42 = vpop.eup %2499 }
 0x747   :  { %v1485_v46 = vmul.f32 %v2500_v42, %v2496_v38  ;;  %v2502_v50 = vpop.eup %2501 }
 0x748   :  { %v1484_v37 = vmul.f32 %v2502_v50, %v3077_v63  ;;  %v1669_v63 = vld [vmem:[#allocation5 + $0x50] sm:$0xff] }
 0x749   :  { %v2504_v5 = vpop.eup %2503  ;;  %v2374_v6 = vpack.c.bf16 %v1670_v4, %v1669_v63 }
 0x74a   :  { %v3121_v62 = vadd.f32 %v1485_v46, %v1484_v37 }
 0x74c   :  { %2505 = vtanh.f32 %v3121_v62 }
 0x756   :  { %v2506_v12 = vpop.eup %2505 }
 0x757   :  { %v1488_v9 = vmul.f32 %v2506_v12, %v2504_v5  ;;  %v1793_v5 = vld [vmem:[%s3153_s4] ss:$0 sm:$0xff] }
 0x759   :  { %1554 = vmatmul.mubr.f32.vlgmr.msra.gmra.mrb[14].mxu0 %v1488_v9  ;;  %1625 = vmatmul.mubr.f32.vlgmr.msra.gmra.mrb[14].mxu1 %v1488_v9 }
 0x75a   :  { %2360 = vmatpush3.bf16.msra.mxu0 %v2359_v31  ;;  %1843 = vmatprep.mubr.msk.f32.mxu0 %vm2604_vm0, %v2601_v0  ;;  %v296_v0 = vadd.f32 %v2819_v33, %v228_v32 }
 0x75b   :  { %2361 = vmatprep.subr.bf16.mxu0 %v2603_v15 }
 0x75e   :  { %2363 = vmatpush3.bf16.msra.mxu0 %v2362_v35 }
 0x75f   :  { %2364 = vmatprep.subr.bf16.mxu0 %v2603_v15 }
 0x762   :  { %2366 = vmatpush3.bf16.msra.mxu0 %v2365_v44 }
 0x763   :  { %2367 = vmatprep.subr.bf16.mxu0 %v2603_v15 }
 0x766   :  { %2369 = vmatpush3.bf16.msra.mxu0 %v2368_v60 }
 0x767   :  { %2370 = vmatprep.subr.bf16.mxu0 %v2603_v15 }
 0x76a   :  { %2372 = vmatpush3.bf16.msra.mxu0 %v2371_v16 }
 0x76b   :  { %2373 = vmatprep.subr.bf16.mxu0 %v2603_v15 }
 0x76e   :  { %2375 = vmatpush3.bf16.msra.mxu0 %v2374_v6 }
 0x76f   :  { %2376 = vmatprep.subr.bf16.mxu0 %v2603_v15 }
 0x772   :  { %2378 = vmatpush3.bf16.msra.mxu0 %v2377_v14 }
 0x773   :  { %2379 = vmatprep.subr.bf16.mxu0 %v2603_v15 }
 0x776   :  { %2381 = vmatpush3.bf16.msra.mxu0 %v2380_v23 }
 0x82c   :  { %v1555_v40 = vpop.f32.mrb[14].mxu0  ;;  %v1626_v41 = vpop.f32.mrb[14].mxu1 }
 0x82d   :  { %v1631_v45 = vadd.f32 %v1555_v40, %v295_v36  ;;  %v1557_v52 = vpop.f32.mrb[15].mxu0  ;;  %v1628_v53 = vpop.f32.mrb[15].mxu1  ;;  %v1633_v13 = vadd.f32 %v1626_v41, %v297_v11 }
 0x82e   :  { %v1632_v54 = vadd.f32 %v1557_v52, %v296_v0  ;;  %v1634_v8 = vadd.f32 %v1628_v53, %v298_v30 }
 0x82f   :  { %v1790_v1 = vmul.f32 -1.442695, %v1631_v45  ;;  %v1792_v17 = vmul.f32 -1.442695, %v1633_v13 }
 0x830   :  { %v1791_v2 = vmul.f32 -1.442695, %v1632_v54 }
 0x831   :  { %2507 = vpow2.f32 %v1790_v1 }
 0x832   :  { %2509 = vpow2.f32 %v1791_v2 }
 0x833   :  { %2511 = vtanh.f32 %v1634_v8 }
 0x834   :  { %2513 = vpow2.f32 %v1792_v17 }
 0x83b   :  { %v2508_v33 = vpop.eup %2507 }
 0x83c   :  { %v1644_v21 = vadd.f32 1.0, %v2508_v33  ;;  %v2510_v22 = vpop.eup %2509 }
 0x83d   :  { %v1645_v34 = vadd.f32 1.0, %v2510_v22  ;;  %v2512_v29 = vpop.eup %2511 }
 0x83e   :  { %2515 = vrcp.f32 %v1644_v21  ;;  %v2514_v38 = vpop.eup %2513 }
 0x83f   :  { %2517 = vrcp.f32 %v1645_v34  ;;  %v1646_v55 = vadd.f32 1.0, %v2514_v38 }
 0x841   :  { %2519 = vrcp.f32 %v1646_v55 }
 0x848   :  { %v2516_v39 = vpop.eup %2515 }
 0x849   :  { %v1655_v56 = vmul.f32 %v2516_v39, %v2512_v29  ;;  %v2518_v42 = vpop.eup %2517 }
 0x84a   :  { %v1654_v46 = vmul.f32 %v2518_v42, %v3121_v62 }
 0x84b   :  { %v2520_v25 = vpop.eup %2519 }
 0x84c   :  { %v1656_v50 = vadd.f32 %v1655_v56, %v1654_v46 }
 0x84e   :  { %2521 = vtanh.f32 %v1656_v50 }
 0x858   :  { %v2522_v51 = vpop.eup %2521 }
 0x859   :  { %v1658_v37 = vmul.f32 %v2522_v51, %v2520_v25 }
 0x85b   :  { %1844 = vmatmul.mubr.f32.vlgmr.msra.gmra.mrb[16].mxu0 %v1658_v37 }
 0x92e   :  { %v1748_v12 = vpop.f32.mrb[16].mxu0 }
 0x92f   :  { %v1749_v9 = vadd.f32 %v1793_v5, %v1748_v12  ;;  %v1845_v20 = vpop.f32.mrb[17].mxu0 }
 0x931   :  { %1752 = vst [vmem:[#allocation7] sm:$0xff] %v1749_v9 }
 0x932   :  { %2578 = shalt.err (!%p2575_p6)
}
 0x933   :  { %s2579_s2 = scalar_lea.hbm %s3154_s5, 128 }
 0x934   :  { %p2580_p7 = scmp.ne.s32.totalorder %s3154_s5, %s2579_s2  ;;  %p2583_p8 = scmp.lt.u32.totalorder %s2579_s2, %s3154_s5 }
 0x936   :  { %p2585_p9 = pnand %p2583_p8, %p2580_p7 }
 0x938   :  { %2588 = shalt.err (!%p2585_p9)
}
 0x939   :  { %1762 = dma.vmem_to_hbm [thread:$0]  %s1760_s13, 128, %s3154_s5, [#allocation4]  }
 0x93a   :  { %2593 = dma.done.wait [#allocation4], 128  }
 0x93b   :  { %2594 = vsyncadd [#allocation4], 4294967168 }
 0x93c   :  { %1766 = vsyncpa [#allocation3], 1 }
 0x93d   :  { %1767 = vsyncpa [#allocation6], 1 }
 0x93e   :  { %1768 = vsyncpa [#allocation4], 1 }

</bundles_post_ra>
